<compile_context>
chip_gen: v5e
topology: v5e:2x2
jax: 0.10.0
libtpu: 0.0.40
codegen_flags: <defaults>
</compile_context>

<pallas_src>
import functools
import math

import jax
import jax.numpy as jnp
from jax import lax
from jax.experimental import pallas as pl
from jax.experimental.pallas import tpu as pltpu


def _mha_kernel(q_ref, k_ref, v_ref,
                wq_ref, bq_ref, wk_ref, bk_ref, wv_ref, bv_ref, wo_ref, bo_ref,
                x_ref, attn_ref,
                k_cache, v_cache, ctx_scratch,
                *, n_heads, head_dim, inv_scale):
    # Ref shapes (leading size-1 batch dim squeezed away):
    #   q_ref: (tq, D)      k_ref/v_ref: (Lk, D2)
    #   x_ref: (tq, D)      attn_ref:    (n_heads, tq, Lk)
    #   k_cache/v_cache: (Lk, D2) VMEM   ctx_scratch: (tq, D2) VMEM
    f32 = jnp.float32
    cdt = q_ref.dtype                     # MXU operand dtype (bf16)

    qi = pl.program_id(1)

    # fc_k / fc_v once per batch row, cached across every q-tile of this row.
    # (qi is an "arbitrary" grid axis, so megacore sharding cannot invalidate the cache.)
    @pl.when(qi == 0)
    def _():
        K = jnp.dot(k_ref[...], wk_ref[...], preferred_element_type=f32) + bk_ref[...]
        V = jnp.dot(v_ref[...], wv_ref[...], preferred_element_type=f32) + bv_ref[...]
        k_cache[...] = K.astype(cdt)
        v_cache[...] = V.astype(cdt)

    # fc_q for this q-tile; fold 1/scale into Q once instead of dividing the (H,tq,Lk) energy.
    Q = jnp.dot(q_ref[...], wq_ref[...], preferred_element_type=f32) + bq_ref[...]
    Q = (Q * inv_scale).astype(cdt)
    K = k_cache[...]
    V = v_cache[...]

    contract_last = (((1,), (1,)), ((), ()))   # contract last dims (no explicit transpose)

    # Static per-head loop over lane slices of the 2-D slabs.
    # TODO(synk): switch to lax.fori_loop(unroll=2) with 2-head MXU packing once head_dim is
    # a multiple of 128 (BERT-base head_dim=128); at toy head_dim it would force relayouts.
    for h in range(n_heads):
        lo = h * head_dim
        hi = lo + head_dim
        Qh = Q[:, lo:hi]                  # (tq, hd)
        Kh = K[:, lo:hi]                  # (Lk, hd)
        Vh = V[:, lo:hi]                  # (Lk, hd)

        # energy_h[q, k] = Qh[q, :] . Kh[k, :]
        energy = lax.dot_general(Qh, Kh, contract_last,
                                 preferred_element_type=f32)      # (tq, Lk)

        # TODO(synk): mask (masked_fill) and train-mode dropout paths not implemented
        # (mask=None, eval-mode dropout is identity).
        # TODO(synk): for Lk >= ~1-2k, tile Lk with an online-softmax inner loop instead of
        # materializing the full (tq, Lk) energy, to bound VMEM independent of Lk.

        # Numerically-stable softmax over the key axis (denominator on the EUP slot).
        m = jnp.max(energy, axis=-1, keepdims=True)
        e = jnp.exp(energy - m)
        denom = jnp.sum(e, axis=-1, keepdims=True)
        attention = e * pl.reciprocal(denom, approx=True)          # (tq, Lk) f32

        attn_ref[h] = attention.astype(attn_ref.dtype)

        # ctx_h into its static lane slice of the merged-heads scratch (no (L,H,hd) relayout).
        ctx = jnp.dot(attention.astype(cdt), Vh,
                      preferred_element_type=f32)                  # (tq, hd)
        ctx_scratch[:, lo:hi] = ctx.astype(cdt)

    # Single full-contraction fc_o matmul (D2-wide) instead of H narrow head_dim matmuls.
    out = jnp.dot(ctx_scratch[...], wo_ref[...], preferred_element_type=f32) + bo_ref[...]
    x_ref[...] = out.astype(x_ref.dtype)


def _resident_vmem_bytes(q_tile, *, Lk, D, D2, n_heads,
                         cdt_bytes, x_bytes, attn_bytes, weight_bufs):
    """Rough per-step VMEM residency for the chosen tiling."""
    weights = (D * D2 + 2 * D2 * D2 + D2 * D) * cdt_bytes * weight_bufs
    biases = (3 * D2 + D) * 4 * weight_bufs
    q_blk = 2 * q_tile * D * cdt_bytes                 # double-buffered q input block
    kv_blk = 2 * 2 * Lk * D2 * cdt_bytes               # double-buffered raw K/V input blocks
    kv_cache = 2 * Lk * D2 * cdt_bytes                 # projected K/V scratch
    ctx = q_tile * D2 * cdt_bytes                      # merged-heads context scratch
    x_blk = 2 * q_tile * D * x_bytes                   # double-buffered x output block
    attn_blk = 2 * n_heads * q_tile * Lk * attn_bytes  # double-buffered attention block
    temps = 3 * q_tile * D2 * 4 + 3 * q_tile * Lk * 4 + 2 * Lk * D2 * 4
    return weights + biases + q_blk + kv_blk + kv_cache + ctx + x_blk + attn_blk + temps


def bert_mha_forward(query, key, value, params, *, n_heads, q_tile=None,
                     compute_dtype=jnp.bfloat16, attn_dtype=jnp.bfloat16):
    """query: [B, Lq, D]; key/value: [B, Lk, 2D].

    Returns (x: [B, Lq, D] in query.dtype, attention: [B, n_heads, Lq, Lk] in attn_dtype).
    """
    B, Lq, D = query.shape
    Bk, Lk, D2 = key.shape
    assert Bk == B and key.shape == value.shape and D2 == 2 * D
    assert D2 % n_heads == 0
    head_dim = D2 // n_heads
    inv_scale = 1.0 / math.sqrt(float(head_dim))

    wq, bq, wk, bk, wv, bv, wo, bo = params

    cdt = compute_dtype
    cdt_bytes = jnp.dtype(cdt).itemsize
    x_bytes = jnp.dtype(query.dtype).itemsize
    attn_bytes = jnp.dtype(attn_dtype).itemsize

    # Physical VMEM (v5e/v6e: 128 MiB, v7x: 64 MiB); conservative fallback if unavailable.
    try:
        vmem_cap = int(pltpu.get_tpu_info().vmem_capacity_bytes)
    except Exception:
        vmem_cap = 64 * 1024 * 1024

    res = functools.partial(_resident_vmem_bytes, Lk=Lk, D=D, D2=D2, n_heads=n_heads,
                            cdt_bytes=cdt_bytes, x_bytes=x_bytes, attn_bytes=attn_bytes,
                            weight_bufs=1)

    # q_tile from a VMEM budget that includes the (H, q_tile, Lk) attention output block.
    # TODO(synk): ragged / non-divisible Lq needs a padding+masking path.
    if q_tile is None:
        q_tile = Lq
        if Lq > 256:
            budget = int(vmem_cap * 0.7)
            for cand in (512, 256, 128):
                if Lq % cand == 0 and res(cand) <= budget:
                    q_tile = cand
                    break
            else:
                for cand in (256, 128, 64, 32, 16, 8):
                    if Lq % cand == 0:
                        q_tile = cand
                        break
    assert Lq % q_tile == 0, "Lq must be divisible by q_tile"
    n_q = Lq // q_tile

    q_c = query.astype(cdt)
    k_c = key.astype(cdt)
    v_c = value.astype(cdt)
    wq_c, wk_c, wv_c, wo_c = (w.astype(cdt) for w in (wq, wk, wv, wo))
    # Biases as lane-dense (1, out_dim) f32 rows (clean broadcast after the dot).
    bq_r = bq.reshape(1, D2).astype(jnp.float32)
    bk_r = bk.reshape(1, D2).astype(jnp.float32)
    bv_r = bv.reshape(1, D2).astype(jnp.float32)
    bo_r = bo.reshape(1, D).astype(jnp.float32)

    kernel = functools.partial(_mha_kernel, n_heads=n_heads, head_dim=head_dim,
                               inv_scale=inv_scale)

    # Explicit scoped-VMEM limit from the actual resident set, under physical capacity.
    need = res(q_tile)
    vmem_limit = int(min(max(need * 3 // 2 + (4 << 20), 32 << 20), int(vmem_cap * 0.9)))

    # Advisory cost estimate (K/V projections now once per batch row, not per q-tile).
    flops = int(2 * B * (Lq * D * D2 + 2 * Lk * D2 * D2
                         + 2 * n_heads * Lq * Lk * head_dim + Lq * D2 * D))
    transcendentals = int(B * n_heads * Lq * Lk)
    nbytes = lambda a: int(a.size) * a.dtype.itemsize
    bytes_accessed = int(sum(nbytes(a) for a in (q_c, k_c, v_c, wq_c, bq_r, wk_c, bk_r,
                                                 wv_c, bv_r, wo_c, bo_r))
                         + B * Lq * D * x_bytes + B * n_heads * Lq * Lk * attn_bytes)

    args = (q_c, k_c, v_c, wq_c, bq_r, wk_c, bk_r, wv_c, bv_r, wo_c, bo_r)

    def build(weight_pipeline_mode):
        def const_spec(arr):
            nd = arr.ndim
            kwargs = {}
            if weight_pipeline_mode is not None:
                kwargs["pipeline_mode"] = weight_pipeline_mode
            return pl.BlockSpec(arr.shape, lambda b, qi: (0,) * nd, **kwargs)

        return pl.pallas_call(
            kernel,
            out_shape=(
                jax.ShapeDtypeStruct((B, Lq, D), query.dtype),
                jax.ShapeDtypeStruct((B, n_heads, Lq, Lk), attn_dtype),
            ),
            grid_spec=pltpu.PrefetchScalarGridSpec(
                num_scalar_prefetch=0,
                grid=(B, n_q),
                in_specs=[
                    pl.BlockSpec((pl.Squeezed(), q_tile, D), lambda b, qi: (b, qi, 0)),
                    pl.BlockSpec((pl.Squeezed(), Lk, D2), lambda b, qi: (b, 0, 0)),
                    pl.BlockSpec((pl.Squeezed(), Lk, D2), lambda b, qi: (b, 0, 0)),
                    const_spec(wq_c), const_spec(bq_r),
                    const_spec(wk_c), const_spec(bk_r),
                    const_spec(wv_c), const_spec(bv_r),
                    const_spec(wo_c), const_spec(bo_r),
                ],
                out_specs=[
                    pl.BlockSpec((pl.Squeezed(), q_tile, D), lambda b, qi: (b, qi, 0)),
                    pl.BlockSpec((pl.Squeezed(), n_heads, q_tile, Lk),
                                 lambda b, qi: (b, 0, qi, 0)),
                ],
                scratch_shapes=[
                    pltpu.VMEM((Lk, D2), cdt),       # projected K cache (per batch row)
                    pltpu.VMEM((Lk, D2), cdt),       # projected V cache (per batch row)
                    pltpu.VMEM((q_tile, D2), cdt),   # merged-heads context for fc_o
                ],
            ),
            compiler_params=pltpu.CompilerParams(
                # qi must be "arbitrary": the K/V scratch cache is only valid if every
                # q-tile of a batch row runs on the same core; B feeds both v7x cores.
                dimension_semantics=("parallel", "arbitrary"),
                vmem_limit_bytes=vmem_limit),
            cost_estimate=pl.CostEstimate(flops=flops,
                                          transcendentals=transcendentals,
                                          bytes_accessed=bytes_accessed),
        )

    try:
        # Single-buffer the constant-index weight/bias blocks (halves their VMEM footprint).
        return build(pl.Buffered(1))(*args)
    except Exception:
        # Fallback: default (double-buffered) weight specs if Buffered(1) is rejected.
        return build(None)(*args)


def _reference(query, key, value, params, *, n_heads):
    """Pure-JAX f32 reference mirroring the PyTorch forward (mask=None, eval dropout)."""
    wq, bq, wk, bk, wv, bv, wo, bo = params
    B, Lq, D = query.shape
    D2 = 2 * D
    head_dim = D2 // n_heads
    scale = jnp.sqrt(jnp.float32(head_dim))
    Q = query @ wq + bq
    K = key @ wk + bk
    V = value @ wv + bv
    Q = Q.reshape(B, -1, n_heads, head_dim).transpose(0, 2, 1, 3)
    K = K.reshape(B, -1, n_heads, head_dim).transpose(0, 2, 1, 3)
    V = V.reshape(B, -1, n_heads, head_dim).transpose(0, 2, 1, 3)
    energy = jnp.einsum('bhqd,bhkd->bhqk', Q, K) / scale
    attention = jax.nn.softmax(energy, axis=-1)
    x = jnp.einsum('bhqk,bhkd->bhqd', attention, V)
    x = x.transpose(0, 2, 1, 3).reshape(B, -1, D2)
    x = x @ wo + bo
    return x, attention


if __name__ == "__main__":
    B, L, hid_dim, n_heads = 2, 8, 32, 4
    D2 = hid_dim * 2

    key0 = jax.random.PRNGKey(0)
    ks = jax.random.split(key0, 12)

    # Deterministic "parameters" (nn.Linear shapes; stored transposed: [in, out]).
    wq = jax.random.normal(ks[0], (hid_dim, D2), jnp.float32) * 0.05
    bq = jax.random.normal(ks[1], (D2,), jnp.float32) * 0.05
    wk = jax.random.normal(ks[2], (D2, D2), jnp.float32) * 0.05
    bk = jax.random.normal(ks[3], (D2,), jnp.float32) * 0.05
    wv = jax.random.normal(ks[4], (D2, D2), jnp.float32) * 0.05
    bv = jax.random.normal(ks[5], (D2,), jnp.float32) * 0.05
    wo = jax.random.normal(ks[6], (D2, hid_dim), jnp.float32) * 0.05
    bo = jax.random.normal(ks[7], (hid_dim,), jnp.float32) * 0.05
    params = (wq, bq, wk, bk, wv, bv, wo, bo)

    query = jax.random.normal(ks[8], (B, L, hid_dim), jnp.float32)
    key_in = jax.random.normal(ks[9], (B, L, D2), jnp.float32)
    value = jax.random.normal(ks[10], (B, L, D2), jnp.float32)

    x, attn = bert_mha_forward(query, key_in, value, params, n_heads=n_heads)
    jax.block_until_ready((x, attn))

    x_ref, attn_ref = _reference(query, key_in, value, params, n_heads=n_heads)
    # bf16 MXU operands, bf16 attention output and approx reciprocal -> loose tolerance.
    assert jnp.allclose(x.astype(jnp.float32), x_ref, atol=2e-2, rtol=2e-2), "x mismatch"
    assert jnp.allclose(attn.astype(jnp.float32), attn_ref, atol=2e-2, rtol=2e-2), \
        "attention mismatch"

    print("KERNEL_OK")
</pallas_src>

<mosaic_0001>
module attributes {stable_mosaic.version = 11 : i64} {
  func.func @_mha_kernel(%arg0: i32, %arg1: i32, %arg2: memref<1x8x32xbf16, #tpu.memory_space<vmem>>, %arg3: memref<1x8x64xbf16, #tpu.memory_space<vmem>>, %arg4: memref<1x8x64xbf16, #tpu.memory_space<vmem>>, %arg5: memref<32x64xbf16, #tpu.memory_space<vmem>>, %arg6: memref<1x64xf32, #tpu.memory_space<vmem>>, %arg7: memref<64x64xbf16, #tpu.memory_space<vmem>>, %arg8: memref<1x64xf32, #tpu.memory_space<vmem>>, %arg9: memref<64x64xbf16, #tpu.memory_space<vmem>>, %arg10: memref<1x64xf32, #tpu.memory_space<vmem>>, %arg11: memref<64x32xbf16, #tpu.memory_space<vmem>>, %arg12: memref<1x32xf32, #tpu.memory_space<vmem>>, %arg13: memref<1x8x32xf32, #tpu.memory_space<vmem>>, %arg14: memref<1x4x8x8xbf16, #tpu.memory_space<vmem>>, %arg15: memref<8x64xbf16, #tpu.memory_space<vmem>>, %arg16: memref<8x64xbf16, #tpu.memory_space<vmem>>, %arg17: memref<8x64xbf16, #tpu.memory_space<vmem>>) attributes {dimension_semantics = [#tpu.dimension_semantics<parallel>, #tpu.dimension_semantics<arbitrary>], iteration_bounds = array<i64: 2, 1>, scalar_prefetch = 0 : i64, scratch_operands = 3 : i64, tpu.core_type = #tpu.core_type<tc>, window_params = [{transform_indices = @transform_0, window_bounds = array<i64: 1, 8, 32>}, {transform_indices = @transform_1, window_bounds = array<i64: 1, 8, 64>}, {transform_indices = @transform_2, window_bounds = array<i64: 1, 8, 64>}, {pipeline_mode = #tpu.pipeline_mode<synchronous>, transform_indices = @transform_3, window_bounds = array<i64: 32, 64>}, {pipeline_mode = #tpu.pipeline_mode<synchronous>, transform_indices = @transform_4, window_bounds = array<i64: 1, 64>}, {pipeline_mode = #tpu.pipeline_mode<synchronous>, transform_indices = @transform_5, window_bounds = array<i64: 64, 64>}, {pipeline_mode = #tpu.pipeline_mode<synchronous>, transform_indices = @transform_6, window_bounds = array<i64: 1, 64>}, {pipeline_mode = #tpu.pipeline_mode<synchronous>, transform_indices = @transform_7, window_bounds = array<i64: 64, 64>}, {pipeline_mode = #tpu.pipeline_mode<synchronous>, transform_indices = @transform_8, window_bounds = array<i64: 1, 64>}, {pipeline_mode = #tpu.pipeline_mode<synchronous>, transform_indices = @transform_9, window_bounds = array<i64: 64, 32>}, {pipeline_mode = #tpu.pipeline_mode<synchronous>, transform_indices = @transform_10, window_bounds = array<i64: 1, 32>}, {transform_indices = @transform_11, window_bounds = array<i64: 1, 8, 32>}, {transform_indices = @transform_12, window_bounds = array<i64: 1, 4, 8, 8>}]} {
    %c0_i32 = arith.constant 0 : i32
    %0 = arith.cmpi eq, %arg1, %c0_i32 : i32
    %1 = arith.extui %0 : i1 to i32
    %c0_i32_0 = arith.constant 0 : i32
    %2 = arith.cmpi ne, %1, %c0_i32_0 : i32
    scf.if %2 {
      %c0_56 = arith.constant 0 : index
      %c0_57 = arith.constant 0 : index
      %c0_58 = arith.constant 0 : index
      %112 = vector.load %arg3[%c0_56, %c0_57, %c0_58] : memref<1x8x64xbf16, #tpu.memory_space<vmem>>, vector<1x8x64xbf16>
      %113 = vector.shape_cast %112 : vector<1x8x64xbf16> to vector<8x64xbf16>
      %c0_59 = arith.constant 0 : index
      %c0_60 = arith.constant 0 : index
      %114 = vector.load %arg7[%c0_59, %c0_60] : memref<64x64xbf16, #tpu.memory_space<vmem>>, vector<64x64xbf16>
      %cst_61 = arith.constant dense<0.000000e+00> : vector<8x64xf32>
      %115 = tpu.matmul %113, %114, %cst_61 {dimension_numbers = #tpu.dot_dimension_numbers<[1], [0], [0], [1], [0, 0, 1, 1], [], []>} : vector<8x64xbf16>, vector<64x64xbf16>, vector<8x64xf32> -> vector<8x64xf32>
      %c0_62 = arith.constant 0 : index
      %c0_63 = arith.constant 0 : index
      %116 = vector.load %arg8[%c0_62, %c0_63] : memref<1x64xf32, #tpu.memory_space<vmem>>, vector<1x64xf32>
      %117 = vector.broadcast %116 : vector<1x64xf32> to vector<8x64xf32>
      %118 = arith.addf %115, %117 : vector<8x64xf32>
      %c0_64 = arith.constant 0 : index
      %c0_65 = arith.constant 0 : index
      %c0_66 = arith.constant 0 : index
      %119 = vector.load %arg4[%c0_64, %c0_65, %c0_66] : memref<1x8x64xbf16, #tpu.memory_space<vmem>>, vector<1x8x64xbf16>
      %120 = vector.shape_cast %119 : vector<1x8x64xbf16> to vector<8x64xbf16>
      %c0_67 = arith.constant 0 : index
      %c0_68 = arith.constant 0 : index
      %121 = vector.load %arg9[%c0_67, %c0_68] : memref<64x64xbf16, #tpu.memory_space<vmem>>, vector<64x64xbf16>
      %cst_69 = arith.constant dense<0.000000e+00> : vector<8x64xf32>
      %122 = tpu.matmul %120, %121, %cst_69 {dimension_numbers = #tpu.dot_dimension_numbers<[1], [0], [0], [1], [0, 0, 1, 1], [], []>} : vector<8x64xbf16>, vector<64x64xbf16>, vector<8x64xf32> -> vector<8x64xf32>
      %c0_70 = arith.constant 0 : index
      %c0_71 = arith.constant 0 : index
      %123 = vector.load %arg10[%c0_70, %c0_71] : memref<1x64xf32, #tpu.memory_space<vmem>>, vector<1x64xf32>
      %124 = vector.broadcast %123 : vector<1x64xf32> to vector<8x64xf32>
      %125 = arith.addf %122, %124 : vector<8x64xf32>
      %126 = arith.truncf %118 : vector<8x64xf32> to vector<8x64xbf16>
      %c0_72 = arith.constant 0 : index
      %c0_73 = arith.constant 0 : index
      %127 = vector.load %arg15[%c0_72, %c0_73] : memref<8x64xbf16, #tpu.memory_space<vmem>>, vector<8x64xbf16>
      tpu.vector_store %arg15[%c0_72, %c0_73], %126 {strides = array<i32>} : memref<8x64xbf16, #tpu.memory_space<vmem>>, vector<8x64xbf16>,
      %128 = arith.truncf %125 : vector<8x64xf32> to vector<8x64xbf16>
      %c0_74 = arith.constant 0 : index
      %c0_75 = arith.constant 0 : index
      %129 = vector.load %arg16[%c0_74, %c0_75] : memref<8x64xbf16, #tpu.memory_space<vmem>>, vector<8x64xbf16>
      tpu.vector_store %arg16[%c0_74, %c0_75], %128 {strides = array<i32>} : memref<8x64xbf16, #tpu.memory_space<vmem>>, vector<8x64xbf16>,
    } else {
    }
    %c0 = arith.constant 0 : index
    %c0_1 = arith.constant 0 : index
    %c0_2 = arith.constant 0 : index
    %3 = vector.load %arg2[%c0, %c0_1, %c0_2] : memref<1x8x32xbf16, #tpu.memory_space<vmem>>, vector<1x8x32xbf16>
    %4 = vector.shape_cast %3 : vector<1x8x32xbf16> to vector<8x32xbf16>
    %c0_3 = arith.constant 0 : index
    %c0_4 = arith.constant 0 : index
    %5 = vector.load %arg5[%c0_3, %c0_4] : memref<32x64xbf16, #tpu.memory_space<vmem>>, vector<32x64xbf16>
    %cst = arith.constant dense<0.000000e+00> : vector<8x64xf32>
    %6 = tpu.matmul %4, %5, %cst {dimension_numbers = #tpu.dot_dimension_numbers<[1], [0], [0], [1], [0, 0, 1, 1], [], []>} : vector<8x32xbf16>, vector<32x64xbf16>, vector<8x64xf32> -> vector<8x64xf32>
    %c0_5 = arith.constant 0 : index
    %c0_6 = arith.constant 0 : index
    %7 = vector.load %arg6[%c0_5, %c0_6] : memref<1x64xf32, #tpu.memory_space<vmem>>, vector<1x64xf32>
    %8 = vector.broadcast %7 : vector<1x64xf32> to vector<8x64xf32>
    %9 = arith.addf %6, %8 : vector<8x64xf32>
    %cst_7 = arith.constant 2.500000e-01 : f32
    %10 = vector.broadcast %cst_7 : f32 to vector<8x64xf32>
    %11 = arith.mulf %9, %10 : vector<8x64xf32>
    %12 = arith.truncf %11 : vector<8x64xf32> to vector<8x64xbf16>
    %c0_8 = arith.constant 0 : index
    %c0_9 = arith.constant 0 : index
    %13 = vector.load %arg15[%c0_8, %c0_9] : memref<8x64xbf16, #tpu.memory_space<vmem>>, vector<8x64xbf16>
    %c0_10 = arith.constant 0 : index
    %c0_11 = arith.constant 0 : index
    %14 = vector.load %arg16[%c0_10, %c0_11] : memref<8x64xbf16, #tpu.memory_space<vmem>>, vector<8x64xbf16>
    %15 = vector.extract_strided_slice %12 {offsets = [0, 0], sizes = [8, 16], strides = [1, 1]} : vector<8x64xbf16> to vector<8x16xbf16>
    %16 = vector.extract_strided_slice %13 {offsets = [0, 0], sizes = [8, 16], strides = [1, 1]} : vector<8x64xbf16> to vector<8x16xbf16>
    %17 = vector.extract_strided_slice %14 {offsets = [0, 0], sizes = [8, 16], strides = [1, 1]} : vector<8x64xbf16> to vector<8x16xbf16>
    %cst_12 = arith.constant dense<0.000000e+00> : vector<8x8xf32>
    %18 = tpu.matmul %15, %16, %cst_12 {dimension_numbers = #tpu.dot_dimension_numbers<[1], [1], [0], [0], [0, 0, 1, 0], [], []>} : vector<8x16xbf16>, vector<8x16xbf16>, vector<8x8xf32> -> vector<8x8xf32>
    %cst_13 = arith.constant dense<0xFF800000> : vector<8xf32>
    %19 = vector.multi_reduction <maximumf>, %18, %cst_13 [1] : vector<8x8xf32> to vector<8xf32>
    %20 = vector.shape_cast %19 : vector<8xf32> to vector<8x1xf32>
    %21 = vector.broadcast %20 : vector<8x1xf32> to vector<8x8xf32>
    %22 = arith.subf %18, %21 : vector<8x8xf32>
    %23 = math.exp %22 : vector<8x8xf32>
    %cst_14 = arith.constant dense<0.000000e+00> : vector<8xf32>
    %24 = vector.multi_reduction <add>, %23, %cst_14 [1] : vector<8x8xf32> to vector<8xf32>
    %25 = vector.shape_cast %24 : vector<8xf32> to vector<8x1xf32>
    %26 = tpu.reciprocal %25 {approx = true} : vector<8x1xf32> -> vector<8x1xf32>
    %27 = vector.broadcast %26 : vector<8x1xf32> to vector<8x8xf32>
    %28 = arith.mulf %23, %27 : vector<8x8xf32>
    %29 = arith.truncf %28 : vector<8x8xf32> to vector<8x8xbf16>
    %c0_15 = arith.constant 0 : index
    %c0_16 = arith.constant 0 : index
    %c0_17 = arith.constant 0 : index
    %c0_18 = arith.constant 0 : index
    %30 = vector.load %arg14[%c0_15, %c0_16, %c0_17, %c0_18] : memref<1x4x8x8xbf16, #tpu.memory_space<vmem>>, vector<1x1x8x8xbf16>
    %31 = vector.shape_cast %30 : vector<1x1x8x8xbf16> to vector<8x8xbf16>
    %32 = vector.shape_cast %29 : vector<8x8xbf16> to vector<1x1x8x8xbf16>
    tpu.vector_store %arg14[%c0_15, %c0_16, %c0_17, %c0_18], %32 {strides = array<i32>} : memref<1x4x8x8xbf16, #tpu.memory_space<vmem>>, vector<1x1x8x8xbf16>,
    %33 = arith.truncf %28 : vector<8x8xf32> to vector<8x8xbf16>
    %cst_19 = arith.constant dense<0.000000e+00> : vector<8x16xf32>
    %34 = tpu.matmul %33, %17, %cst_19 {dimension_numbers = #tpu.dot_dimension_numbers<[1], [0], [0], [1], [0, 0, 1, 1], [], []>} : vector<8x8xbf16>, vector<8x16xbf16>, vector<8x16xf32> -> vector<8x16xf32>
    %35 = arith.truncf %34 : vector<8x16xf32> to vector<8x16xbf16>
    %c0_20 = arith.constant 0 : index
    %c0_21 = arith.constant 0 : index
    %36 = vector.load %arg17[%c0_20, %c0_21] : memref<8x64xbf16, #tpu.memory_space<vmem>>, vector<8x16xbf16>
    tpu.vector_store %arg17[%c0_20, %c0_21], %35 {strides = array<i32>} : memref<8x64xbf16, #tpu.memory_space<vmem>>, vector<8x16xbf16>,
    %37 = vector.extract_strided_slice %12 {offsets = [0, 16], sizes = [8, 16], strides = [1, 1]} : vector<8x64xbf16> to vector<8x16xbf16>
    %38 = vector.extract_strided_slice %13 {offsets = [0, 16], sizes = [8, 16], strides = [1, 1]} : vector<8x64xbf16> to vector<8x16xbf16>
    %39 = vector.extract_strided_slice %14 {offsets = [0, 16], sizes = [8, 16], strides = [1, 1]} : vector<8x64xbf16> to vector<8x16xbf16>
    %cst_22 = arith.constant dense<0.000000e+00> : vector<8x8xf32>
    %40 = tpu.matmul %37, %38, %cst_22 {dimension_numbers = #tpu.dot_dimension_numbers<[1], [1], [0], [0], [0, 0, 1, 0], [], []>} : vector<8x16xbf16>, vector<8x16xbf16>, vector<8x8xf32> -> vector<8x8xf32>
    %cst_23 = arith.constant dense<0xFF800000> : vector<8xf32>
    %41 = vector.multi_reduction <maximumf>, %40, %cst_23 [1] : vector<8x8xf32> to vector<8xf32>
    %42 = vector.shape_cast %41 : vector<8xf32> to vector<8x1xf32>
    %43 = vector.broadcast %42 : vector<8x1xf32> to vector<8x8xf32>
    %44 = arith.subf %40, %43 : vector<8x8xf32>
    %45 = math.exp %44 : vector<8x8xf32>
    %cst_24 = arith.constant dense<0.000000e+00> : vector<8xf32>
    %46 = vector.multi_reduction <add>, %45, %cst_24 [1] : vector<8x8xf32> to vector<8xf32>
    %47 = vector.shape_cast %46 : vector<8xf32> to vector<8x1xf32>
    %48 = tpu.reciprocal %47 {approx = true} : vector<8x1xf32> -> vector<8x1xf32>
    %49 = vector.broadcast %48 : vector<8x1xf32> to vector<8x8xf32>
    %50 = arith.mulf %45, %49 : vector<8x8xf32>
    %51 = arith.truncf %50 : vector<8x8xf32> to vector<8x8xbf16>
    %c0_25 = arith.constant 0 : index
    %c1 = arith.constant 1 : index
    %c0_26 = arith.constant 0 : index
    %c0_27 = arith.constant 0 : index
    %52 = vector.load %arg14[%c0_25, %c1, %c0_26, %c0_27] : memref<1x4x8x8xbf16, #tpu.memory_space<vmem>>, vector<1x1x8x8xbf16>
    %53 = vector.shape_cast %52 : vector<1x1x8x8xbf16> to vector<8x8xbf16>
    %54 = vector.shape_cast %51 : vector<8x8xbf16> to vector<1x1x8x8xbf16>
    tpu.vector_store %arg14[%c0_25, %c1, %c0_26, %c0_27], %54 {strides = array<i32>} : memref<1x4x8x8xbf16, #tpu.memory_space<vmem>>, vector<1x1x8x8xbf16>,
    %55 = arith.truncf %50 : vector<8x8xf32> to vector<8x8xbf16>
    %cst_28 = arith.constant dense<0.000000e+00> : vector<8x16xf32>
    %56 = tpu.matmul %55, %39, %cst_28 {dimension_numbers = #tpu.dot_dimension_numbers<[1], [0], [0], [1], [0, 0, 1, 1], [], []>} : vector<8x8xbf16>, vector<8x16xbf16>, vector<8x16xf32> -> vector<8x16xf32>
    %57 = arith.truncf %56 : vector<8x16xf32> to vector<8x16xbf16>
    %c0_29 = arith.constant 0 : index
    %c16 = arith.constant 16 : index
    %58 = vector.load %arg17[%c0_29, %c16] : memref<8x64xbf16, #tpu.memory_space<vmem>>, vector<8x16xbf16>
    tpu.vector_store %arg17[%c0_29, %c16], %57 {strides = array<i32>} : memref<8x64xbf16, #tpu.memory_space<vmem>>, vector<8x16xbf16>,
    %59 = vector.extract_strided_slice %12 {offsets = [0, 32], sizes = [8, 16], strides = [1, 1]} : vector<8x64xbf16> to vector<8x16xbf16>
    %60 = vector.extract_strided_slice %13 {offsets = [0, 32], sizes = [8, 16], strides = [1, 1]} : vector<8x64xbf16> to vector<8x16xbf16>
    %61 = vector.extract_strided_slice %14 {offsets = [0, 32], sizes = [8, 16], strides = [1, 1]} : vector<8x64xbf16> to vector<8x16xbf16>
    %cst_30 = arith.constant dense<0.000000e+00> : vector<8x8xf32>
    %62 = tpu.matmul %59, %60, %cst_30 {dimension_numbers = #tpu.dot_dimension_numbers<[1], [1], [0], [0], [0, 0, 1, 0], [], []>} : vector<8x16xbf16>, vector<8x16xbf16>, vector<8x8xf32> -> vector<8x8xf32>
    %cst_31 = arith.constant dense<0xFF800000> : vector<8xf32>
    %63 = vector.multi_reduction <maximumf>, %62, %cst_31 [1] : vector<8x8xf32> to vector<8xf32>
    %64 = vector.shape_cast %63 : vector<8xf32> to vector<8x1xf32>
    %65 = vector.broadcast %64 : vector<8x1xf32> to vector<8x8xf32>
    %66 = arith.subf %62, %65 : vector<8x8xf32>
    %67 = math.exp %66 : vector<8x8xf32>
    %cst_32 = arith.constant dense<0.000000e+00> : vector<8xf32>
    %68 = vector.multi_reduction <add>, %67, %cst_32 [1] : vector<8x8xf32> to vector<8xf32>
    %69 = vector.shape_cast %68 : vector<8xf32> to vector<8x1xf32>
    %70 = tpu.reciprocal %69 {approx = true} : vector<8x1xf32> -> vector<8x1xf32>
    %71 = vector.broadcast %70 : vector<8x1xf32> to vector<8x8xf32>
    %72 = arith.mulf %67, %71 : vector<8x8xf32>
    %73 = arith.truncf %72 : vector<8x8xf32> to vector<8x8xbf16>
    %c0_33 = arith.constant 0 : index
    %c2 = arith.constant 2 : index
    %c0_34 = arith.constant 0 : index
    %c0_35 = arith.constant 0 : index
    %74 = vector.load %arg14[%c0_33, %c2, %c0_34, %c0_35] : memref<1x4x8x8xbf16, #tpu.memory_space<vmem>>, vector<1x1x8x8xbf16>
    %75 = vector.shape_cast %74 : vector<1x1x8x8xbf16> to vector<8x8xbf16>
    %76 = vector.shape_cast %73 : vector<8x8xbf16> to vector<1x1x8x8xbf16>
    tpu.vector_store %arg14[%c0_33, %c2, %c0_34, %c0_35], %76 {strides = array<i32>} : memref<1x4x8x8xbf16, #tpu.memory_space<vmem>>, vector<1x1x8x8xbf16>,
    %77 = arith.truncf %72 : vector<8x8xf32> to vector<8x8xbf16>
    %cst_36 = arith.constant dense<0.000000e+00> : vector<8x16xf32>
    %78 = tpu.matmul %77, %61, %cst_36 {dimension_numbers = #tpu.dot_dimension_numbers<[1], [0], [0], [1], [0, 0, 1, 1], [], []>} : vector<8x8xbf16>, vector<8x16xbf16>, vector<8x16xf32> -> vector<8x16xf32>
    %79 = arith.truncf %78 : vector<8x16xf32> to vector<8x16xbf16>
    %c0_37 = arith.constant 0 : index
    %c32 = arith.constant 32 : index
    %80 = vector.load %arg17[%c0_37, %c32] : memref<8x64xbf16, #tpu.memory_space<vmem>>, vector<8x16xbf16>
    tpu.vector_store %arg17[%c0_37, %c32], %79 {strides = array<i32>} : memref<8x64xbf16, #tpu.memory_space<vmem>>, vector<8x16xbf16>,
    %81 = vector.extract_strided_slice %12 {offsets = [0, 48], sizes = [8, 16], strides = [1, 1]} : vector<8x64xbf16> to vector<8x16xbf16>
    %82 = vector.extract_strided_slice %13 {offsets = [0, 48], sizes = [8, 16], strides = [1, 1]} : vector<8x64xbf16> to vector<8x16xbf16>
    %83 = vector.extract_strided_slice %14 {offsets = [0, 48], sizes = [8, 16], strides = [1, 1]} : vector<8x64xbf16> to vector<8x16xbf16>
    %cst_38 = arith.constant dense<0.000000e+00> : vector<8x8xf32>
    %84 = tpu.matmul %81, %82, %cst_38 {dimension_numbers = #tpu.dot_dimension_numbers<[1], [1], [0], [0], [0, 0, 1, 0], [], []>} : vector<8x16xbf16>, vector<8x16xbf16>, vector<8x8xf32> -> vector<8x8xf32>
    %cst_39 = arith.constant dense<0xFF800000> : vector<8xf32>
    %85 = vector.multi_reduction <maximumf>, %84, %cst_39 [1] : vector<8x8xf32> to vector<8xf32>
    %86 = vector.shape_cast %85 : vector<8xf32> to vector<8x1xf32>
    %87 = vector.broadcast %86 : vector<8x1xf32> to vector<8x8xf32>
    %88 = arith.subf %84, %87 : vector<8x8xf32>
    %89 = math.exp %88 : vector<8x8xf32>
    %cst_40 = arith.constant dense<0.000000e+00> : vector<8xf32>
    %90 = vector.multi_reduction <add>, %89, %cst_40 [1] : vector<8x8xf32> to vector<8xf32>
    %91 = vector.shape_cast %90 : vector<8xf32> to vector<8x1xf32>
    %92 = tpu.reciprocal %91 {approx = true} : vector<8x1xf32> -> vector<8x1xf32>
    %93 = vector.broadcast %92 : vector<8x1xf32> to vector<8x8xf32>
    %94 = arith.mulf %89, %93 : vector<8x8xf32>
    %95 = arith.truncf %94 : vector<8x8xf32> to vector<8x8xbf16>
    %c0_41 = arith.constant 0 : index
    %c3 = arith.constant 3 : index
    %c0_42 = arith.constant 0 : index
    %c0_43 = arith.constant 0 : index
    %96 = vector.load %arg14[%c0_41, %c3, %c0_42, %c0_43] : memref<1x4x8x8xbf16, #tpu.memory_space<vmem>>, vector<1x1x8x8xbf16>
    %97 = vector.shape_cast %96 : vector<1x1x8x8xbf16> to vector<8x8xbf16>
    %98 = vector.shape_cast %95 : vector<8x8xbf16> to vector<1x1x8x8xbf16>
    tpu.vector_store %arg14[%c0_41, %c3, %c0_42, %c0_43], %98 {strides = array<i32>} : memref<1x4x8x8xbf16, #tpu.memory_space<vmem>>, vector<1x1x8x8xbf16>,
    %99 = arith.truncf %94 : vector<8x8xf32> to vector<8x8xbf16>
    %cst_44 = arith.constant dense<0.000000e+00> : vector<8x16xf32>
    %100 = tpu.matmul %99, %83, %cst_44 {dimension_numbers = #tpu.dot_dimension_numbers<[1], [0], [0], [1], [0, 0, 1, 1], [], []>} : vector<8x8xbf16>, vector<8x16xbf16>, vector<8x16xf32> -> vector<8x16xf32>
    %101 = arith.truncf %100 : vector<8x16xf32> to vector<8x16xbf16>
    %c0_45 = arith.constant 0 : index
    %c48 = arith.constant 48 : index
    %102 = vector.load %arg17[%c0_45, %c48] : memref<8x64xbf16, #tpu.memory_space<vmem>>, vector<8x16xbf16>
    tpu.vector_store %arg17[%c0_45, %c48], %101 {strides = array<i32>} : memref<8x64xbf16, #tpu.memory_space<vmem>>, vector<8x16xbf16>,
    %c0_46 = arith.constant 0 : index
    %c0_47 = arith.constant 0 : index
    %103 = vector.load %arg17[%c0_46, %c0_47] : memref<8x64xbf16, #tpu.memory_space<vmem>>, vector<8x64xbf16>
    %c0_48 = arith.constant 0 : index
    %c0_49 = arith.constant 0 : index
    %104 = vector.load %arg11[%c0_48, %c0_49] : memref<64x32xbf16, #tpu.memory_space<vmem>>, vector<64x32xbf16>
    %cst_50 = arith.constant dense<0.000000e+00> : vector<8x32xf32>
    %105 = tpu.matmul %103, %104, %cst_50 {dimension_numbers = #tpu.dot_dimension_numbers<[1], [0], [0], [1], [0, 0, 1, 1], [], []>} : vector<8x64xbf16>, vector<64x32xbf16>, vector<8x32xf32> -> vector<8x32xf32>
    %c0_51 = arith.constant 0 : index
    %c0_52 = arith.constant 0 : index
    %106 = vector.load %arg12[%c0_51, %c0_52] : memref<1x32xf32, #tpu.memory_space<vmem>>, vector<1x32xf32>
    %107 = vector.broadcast %106 : vector<1x32xf32> to vector<8x32xf32>
    %108 = arith.addf %105, %107 : vector<8x32xf32>
    %c0_53 = arith.constant 0 : index
    %c0_54 = arith.constant 0 : index
    %c0_55 = arith.constant 0 : index
    %109 = vector.load %arg13[%c0_53, %c0_54, %c0_55] : memref<1x8x32xf32, #tpu.memory_space<vmem>>, vector<1x8x32xf32>
    %110 = vector.shape_cast %109 : vector<1x8x32xf32> to vector<8x32xf32>
    %111 = vector.shape_cast %108 : vector<8x32xf32> to vector<1x8x32xf32>
    tpu.vector_store %arg13[%c0_53, %c0_54, %c0_55], %111 {strides = array<i32>} : memref<1x8x32xf32, #tpu.memory_space<vmem>>, vector<1x8x32xf32>,
    return
  }
  func.func @transform_0(%arg0: i32, %arg1: i32) -> (i32, i32, i32) {
    %c0_i32 = arith.constant 0 : i32
    %c0_i32_0 = arith.constant 0 : i32
    return %arg0, %arg1, %c0_i32 : i32, i32, i32
  }
  func.func @transform_1(%arg0: i32, %arg1: i32) -> (i32, i32, i32) {
    %c0_i32 = arith.constant 0 : i32
    %c0_i32_0 = arith.constant 0 : i32
    %c0_i32_1 = arith.constant 0 : i32
    return %arg0, %c0_i32, %c0_i32_0 : i32, i32, i32
  }
  func.func @transform_2(%arg0: i32, %arg1: i32) -> (i32, i32, i32) {
    %c0_i32 = arith.constant 0 : i32
    %c0_i32_0 = arith.constant 0 : i32
    %c0_i32_1 = arith.constant 0 : i32
    return %arg0, %c0_i32, %c0_i32_0 : i32, i32, i32
  }
  func.func @transform_3(%arg0: i32, %arg1: i32) -> (i32, i32) {
    %c0_i32 = arith.constant 0 : i32
    %c0_i32_0 = arith.constant 0 : i32
    %c0_i32_1 = arith.constant 0 : i32
    return %c0_i32, %c0_i32_0 : i32, i32
  }
  func.func @transform_4(%arg0: i32, %arg1: i32) -> (i32, i32) {
    %c0_i32 = arith.constant 0 : i32
    %c0_i32_0 = arith.constant 0 : i32
    %c0_i32_1 = arith.constant 0 : i32
    return %c0_i32, %c0_i32_0 : i32, i32
  }
  func.func @transform_5(%arg0: i32, %arg1: i32) -> (i32, i32) {
    %c0_i32 = arith.constant 0 : i32
    %c0_i32_0 = arith.constant 0 : i32
    %c0_i32_1 = arith.constant 0 : i32
    return %c0_i32, %c0_i32_0 : i32, i32
  }
  func.func @transform_6(%arg0: i32, %arg1: i32) -> (i32, i32) {
    %c0_i32 = arith.constant 0 : i32
    %c0_i32_0 = arith.constant 0 : i32
    %c0_i32_1 = arith.constant 0 : i32
    return %c0_i32, %c0_i32_0 : i32, i32
  }
  func.func @transform_7(%arg0: i32, %arg1: i32) -> (i32, i32) {
    %c0_i32 = arith.constant 0 : i32
    %c0_i32_0 = arith.constant 0 : i32
    %c0_i32_1 = arith.constant 0 : i32
    return %c0_i32, %c0_i32_0 : i32, i32
  }
  func.func @transform_8(%arg0: i32, %arg1: i32) -> (i32, i32) {
    %c0_i32 = arith.constant 0 : i32
    %c0_i32_0 = arith.constant 0 : i32
    %c0_i32_1 = arith.constant 0 : i32
    return %c0_i32, %c0_i32_0 : i32, i32
  }
  func.func @transform_9(%arg0: i32, %arg1: i32) -> (i32, i32) {
    %c0_i32 = arith.constant 0 : i32
    %c0_i32_0 = arith.constant 0 : i32
    %c0_i32_1 = arith.constant 0 : i32
    return %c0_i32, %c0_i32_0 : i32, i32
  }
  func.func @transform_10(%arg0: i32, %arg1: i32) -> (i32, i32) {
    %c0_i32 = arith.constant 0 : i32
    %c0_i32_0 = arith.constant 0 : i32
    %c0_i32_1 = arith.constant 0 : i32
    return %c0_i32, %c0_i32_0 : i32, i32
  }
  func.func @transform_11(%arg0: i32, %arg1: i32) -> (i32, i32, i32) {
    %c0_i32 = arith.constant 0 : i32
    %c0_i32_0 = arith.constant 0 : i32
    return %arg0, %arg1, %c0_i32 : i32, i32, i32
  }
  func.func @transform_12(%arg0: i32, %arg1: i32) -> (i32, i32, i32, i32) {
    %c0_i32 = arith.constant 0 : i32
    %c0_i32_0 = arith.constant 0 : i32
    %c0_i32_1 = arith.constant 0 : i32
    return %arg0, %c0_i32, %arg1, %c0_i32_0 : i32, i32, i32, i32
  }
}

module attributes {stable_mosaic.version = 11 : i64} {
  func.func @_mha_kernel(%arg0: i32, %arg1: i32, %arg2: memref<1x8x32xbf16, #tpu.memory_space<vmem>>, %arg3: memref<1x8x64xbf16, #tpu.memory_space<vmem>>, %arg4: memref<1x8x64xbf16, #tpu.memory_space<vmem>>, %arg5: memref<32x64xbf16, #tpu.memory_space<vmem>>, %arg6: memref<1x64xf32, #tpu.memory_space<vmem>>, %arg7: memref<64x64xbf16, #tpu.memory_space<vmem>>, %arg8: memref<1x64xf32, #tpu.memory_space<vmem>>, %arg9: memref<64x64xbf16, #tpu.memory_space<vmem>>, %arg10: memref<1x64xf32, #tpu.memory_space<vmem>>, %arg11: memref<64x32xbf16, #tpu.memory_space<vmem>>, %arg12: memref<1x32xf32, #tpu.memory_space<vmem>>, %arg13: memref<1x8x32xf32, #tpu.memory_space<vmem>>, %arg14: memref<1x4x8x8xbf16, #tpu.memory_space<vmem>>, %arg15: memref<8x64xbf16, #tpu.memory_space<vmem>>, %arg16: memref<8x64xbf16, #tpu.memory_space<vmem>>, %arg17: memref<8x64xbf16, #tpu.memory_space<vmem>>) attributes {dimension_semantics = [#tpu.dimension_semantics<parallel>, #tpu.dimension_semantics<arbitrary>], iteration_bounds = array<i64: 2, 1>, scalar_prefetch = 0 : i64, scratch_operands = 3 : i64, tpu.core_type = #tpu.core_type<tc>, window_params = [{transform_indices = @transform_0, window_bounds = array<i64: 1, 8, 32>}, {transform_indices = @transform_1, window_bounds = array<i64: 1, 8, 64>}, {transform_indices = @transform_2, window_bounds = array<i64: 1, 8, 64>}, {pipeline_mode = #tpu.pipeline_mode<synchronous>, transform_indices = @transform_3, window_bounds = array<i64: 32, 64>}, {pipeline_mode = #tpu.pipeline_mode<synchronous>, transform_indices = @transform_4, window_bounds = array<i64: 1, 64>}, {pipeline_mode = #tpu.pipeline_mode<synchronous>, transform_indices = @transform_5, window_bounds = array<i64: 64, 64>}, {pipeline_mode = #tpu.pipeline_mode<synchronous>, transform_indices = @transform_6, window_bounds = array<i64: 1, 64>}, {pipeline_mode = #tpu.pipeline_mode<synchronous>, transform_indices = @transform_7, window_bounds = array<i64: 64, 64>}, {pipeline_mode = #tpu.pipeline_mode<synchronous>, transform_indices = @transform_8, window_bounds = array<i64: 1, 64>}, {pipeline_mode = #tpu.pipeline_mode<synchronous>, transform_indices = @transform_9, window_bounds = array<i64: 64, 32>}, {pipeline_mode = #tpu.pipeline_mode<synchronous>, transform_indices = @transform_10, window_bounds = array<i64: 1, 32>}, {transform_indices = @transform_11, window_bounds = array<i64: 1, 8, 32>}, {transform_indices = @transform_12, window_bounds = array<i64: 1, 4, 8, 8>}]} {
    %c0_i32 = arith.constant 0 : i32
    %0 = arith.cmpi eq, %arg1, %c0_i32 : i32
    %1 = arith.extui %0 : i1 to i32
    %c0_i32_0 = arith.constant 0 : i32
    %2 = arith.cmpi ne, %1, %c0_i32_0 : i32
    scf.if %2 {
      %c0_56 = arith.constant 0 : index
      %c0_57 = arith.constant 0 : index
      %c0_58 = arith.constant 0 : index
      %112 = vector.load %arg3[%c0_56, %c0_57, %c0_58] : memref<1x8x64xbf16, #tpu.memory_space<vmem>>, vector<1x8x64xbf16>
      %113 = vector.shape_cast %112 : vector<1x8x64xbf16> to vector<8x64xbf16>
      %c0_59 = arith.constant 0 : index
      %c0_60 = arith.constant 0 : index
      %114 = vector.load %arg7[%c0_59, %c0_60] : memref<64x64xbf16, #tpu.memory_space<vmem>>, vector<64x64xbf16>
      %cst_61 = arith.constant dense<0.000000e+00> : vector<8x64xf32>
      %115 = tpu.matmul %113, %114, %cst_61 {dimension_numbers = #tpu.dot_dimension_numbers<[1], [0], [0], [1], [0, 0, 1, 1], [], []>} : vector<8x64xbf16>, vector<64x64xbf16>, vector<8x64xf32> -> vector<8x64xf32>
      %c0_62 = arith.constant 0 : index
      %c0_63 = arith.constant 0 : index
      %116 = vector.load %arg8[%c0_62, %c0_63] : memref<1x64xf32, #tpu.memory_space<vmem>>, vector<1x64xf32>
      %117 = vector.broadcast %116 : vector<1x64xf32> to vector<8x64xf32>
      %118 = arith.addf %115, %117 : vector<8x64xf32>
      %c0_64 = arith.constant 0 : index
      %c0_65 = arith.constant 0 : index
      %c0_66 = arith.constant 0 : index
      %119 = vector.load %arg4[%c0_64, %c0_65, %c0_66] : memref<1x8x64xbf16, #tpu.memory_space<vmem>>, vector<1x8x64xbf16>
      %120 = vector.shape_cast %119 : vector<1x8x64xbf16> to vector<8x64xbf16>
      %c0_67 = arith.constant 0 : index
      %c0_68 = arith.constant 0 : index
      %121 = vector.load %arg9[%c0_67, %c0_68] : memref<64x64xbf16, #tpu.memory_space<vmem>>, vector<64x64xbf16>
      %cst_69 = arith.constant dense<0.000000e+00> : vector<8x64xf32>
      %122 = tpu.matmul %120, %121, %cst_69 {dimension_numbers = #tpu.dot_dimension_numbers<[1], [0], [0], [1], [0, 0, 1, 1], [], []>} : vector<8x64xbf16>, vector<64x64xbf16>, vector<8x64xf32> -> vector<8x64xf32>
      %c0_70 = arith.constant 0 : index
      %c0_71 = arith.constant 0 : index
      %123 = vector.load %arg10[%c0_70, %c0_71] : memref<1x64xf32, #tpu.memory_space<vmem>>, vector<1x64xf32>
      %124 = vector.broadcast %123 : vector<1x64xf32> to vector<8x64xf32>
      %125 = arith.addf %122, %124 : vector<8x64xf32>
      %126 = arith.truncf %118 : vector<8x64xf32> to vector<8x64xbf16>
      %c0_72 = arith.constant 0 : index
      %c0_73 = arith.constant 0 : index
      %127 = vector.load %arg15[%c0_72, %c0_73] : memref<8x64xbf16, #tpu.memory_space<vmem>>, vector<8x64xbf16>
      tpu.vector_store %arg15[%c0_72, %c0_73], %126 {strides = array<i32>} : memref<8x64xbf16, #tpu.memory_space<vmem>>, vector<8x64xbf16>,
      %128 = arith.truncf %125 : vector<8x64xf32> to vector<8x64xbf16>
      %c0_74 = arith.constant 0 : index
      %c0_75 = arith.constant 0 : index
      %129 = vector.load %arg16[%c0_74, %c0_75] : memref<8x64xbf16, #tpu.memory_space<vmem>>, vector<8x64xbf16>
      tpu.vector_store %arg16[%c0_74, %c0_75], %128 {strides = array<i32>} : memref<8x64xbf16, #tpu.memory_space<vmem>>, vector<8x64xbf16>,
    } else {
    }
    %c0 = arith.constant 0 : index
    %c0_1 = arith.constant 0 : index
    %c0_2 = arith.constant 0 : index
    %3 = vector.load %arg2[%c0, %c0_1, %c0_2] : memref<1x8x32xbf16, #tpu.memory_space<vmem>>, vector<1x8x32xbf16>
    %4 = vector.shape_cast %3 : vector<1x8x32xbf16> to vector<8x32xbf16>
    %c0_3 = arith.constant 0 : index
    %c0_4 = arith.constant 0 : index
    %5 = vector.load %arg5[%c0_3, %c0_4] : memref<32x64xbf16, #tpu.memory_space<vmem>>, vector<32x64xbf16>
    %cst = arith.constant dense<0.000000e+00> : vector<8x64xf32>
    %6 = tpu.matmul %4, %5, %cst {dimension_numbers = #tpu.dot_dimension_numbers<[1], [0], [0], [1], [0, 0, 1, 1], [], []>} : vector<8x32xbf16>, vector<32x64xbf16>, vector<8x64xf32> -> vector<8x64xf32>
    %c0_5 = arith.constant 0 : index
    %c0_6 = arith.constant 0 : index
    %7 = vector.load %arg6[%c0_5, %c0_6] : memref<1x64xf32, #tpu.memory_space<vmem>>, vector<1x64xf32>
    %8 = vector.broadcast %7 : vector<1x64xf32> to vector<8x64xf32>
    %9 = arith.addf %6, %8 : vector<8x64xf32>
    %cst_7 = arith.constant 2.500000e-01 : f32
    %10 = vector.broadcast %cst_7 : f32 to vector<8x64xf32>
    %11 = arith.mulf %9, %10 : vector<8x64xf32>
    %12 = arith.truncf %11 : vector<8x64xf32> to vector<8x64xbf16>
    %c0_8 = arith.constant 0 : index
    %c0_9 = arith.constant 0 : index
    %13 = vector.load %arg15[%c0_8, %c0_9] : memref<8x64xbf16, #tpu.memory_space<vmem>>, vector<8x64xbf16>
    %c0_10 = arith.constant 0 : index
    %c0_11 = arith.constant 0 : index
    %14 = vector.load %arg16[%c0_10, %c0_11] : memref<8x64xbf16, #tpu.memory_space<vmem>>, vector<8x64xbf16>
    %15 = vector.extract_strided_slice %12 {offsets = [0, 0], sizes = [8, 16], strides = [1, 1]} : vector<8x64xbf16> to vector<8x16xbf16>
    %16 = vector.extract_strided_slice %13 {offsets = [0, 0], sizes = [8, 16], strides = [1, 1]} : vector<8x64xbf16> to vector<8x16xbf16>
    %17 = vector.extract_strided_slice %14 {offsets = [0, 0], sizes = [8, 16], strides = [1, 1]} : vector<8x64xbf16> to vector<8x16xbf16>
    %cst_12 = arith.constant dense<0.000000e+00> : vector<8x8xf32>
    %18 = tpu.matmul %15, %16, %cst_12 {dimension_numbers = #tpu.dot_dimension_numbers<[1], [1], [0], [0], [0, 0, 1, 0], [], []>} : vector<8x16xbf16>, vector<8x16xbf16>, vector<8x8xf32> -> vector<8x8xf32>
    %cst_13 = arith.constant dense<0xFF800000> : vector<8xf32>
    %19 = vector.multi_reduction <maximumf>, %18, %cst_13 [1] : vector<8x8xf32> to vector<8xf32>
    %20 = vector.shape_cast %19 : vector<8xf32> to vector<8x1xf32>
    %21 = vector.broadcast %20 : vector<8x1xf32> to vector<8x8xf32>
    %22 = arith.subf %18, %21 : vector<8x8xf32>
    %23 = math.exp %22 : vector<8x8xf32>
    %cst_14 = arith.constant dense<0.000000e+00> : vector<8xf32>
    %24 = vector.multi_reduction <add>, %23, %cst_14 [1] : vector<8x8xf32> to vector<8xf32>
    %25 = vector.shape_cast %24 : vector<8xf32> to vector<8x1xf32>
    %26 = tpu.reciprocal %25 {approx = true} : vector<8x1xf32> -> vector<8x1xf32>
    %27 = vector.broadcast %26 : vector<8x1xf32> to vector<8x8xf32>
    %28 = arith.mulf %23, %27 : vector<8x8xf32>
    %29 = arith.truncf %28 : vector<8x8xf32> to vector<8x8xbf16>
    %c0_15 = arith.constant 0 : index
    %c0_16 = arith.constant 0 : index
    %c0_17 = arith.constant 0 : index
    %c0_18 = arith.constant 0 : index
    %30 = vector.load %arg14[%c0_15, %c0_16, %c0_17, %c0_18] : memref<1x4x8x8xbf16, #tpu.memory_space<vmem>>, vector<1x1x8x8xbf16>
    %31 = vector.shape_cast %30 : vector<1x1x8x8xbf16> to vector<8x8xbf16>
    %32 = vector.shape_cast %29 : vector<8x8xbf16> to vector<1x1x8x8xbf16>
    tpu.vector_store %arg14[%c0_15, %c0_16, %c0_17, %c0_18], %32 {strides = array<i32>} : memref<1x4x8x8xbf16, #tpu.memory_space<vmem>>, vector<1x1x8x8xbf16>,
    %33 = arith.truncf %28 : vector<8x8xf32> to vector<8x8xbf16>
    %cst_19 = arith.constant dense<0.000000e+00> : vector<8x16xf32>
    %34 = tpu.matmul %33, %17, %cst_19 {dimension_numbers = #tpu.dot_dimension_numbers<[1], [0], [0], [1], [0, 0, 1, 1], [], []>} : vector<8x8xbf16>, vector<8x16xbf16>, vector<8x16xf32> -> vector<8x16xf32>
    %35 = arith.truncf %34 : vector<8x16xf32> to vector<8x16xbf16>
    %c0_20 = arith.constant 0 : index
    %c0_21 = arith.constant 0 : index
    %36 = vector.load %arg17[%c0_20, %c0_21] : memref<8x64xbf16, #tpu.memory_space<vmem>>, vector<8x16xbf16>
    tpu.vector_store %arg17[%c0_20, %c0_21], %35 {strides = array<i32>} : memref<8x64xbf16, #tpu.memory_space<vmem>>, vector<8x16xbf16>,
    %37 = vector.extract_strided_slice %12 {offsets = [0, 16], sizes = [8, 16], strides = [1, 1]} : vector<8x64xbf16> to vector<8x16xbf16>
    %38 = vector.extract_strided_slice %13 {offsets = [0, 16], sizes = [8, 16], strides = [1, 1]} : vector<8x64xbf16> to vector<8x16xbf16>
    %39 = vector.extract_strided_slice %14 {offsets = [0, 16], sizes = [8, 16], strides = [1, 1]} : vector<8x64xbf16> to vector<8x16xbf16>
    %cst_22 = arith.constant dense<0.000000e+00> : vector<8x8xf32>
    %40 = tpu.matmul %37, %38, %cst_22 {dimension_numbers = #tpu.dot_dimension_numbers<[1], [1], [0], [0], [0, 0, 1, 0], [], []>} : vector<8x16xbf16>, vector<8x16xbf16>, vector<8x8xf32> -> vector<8x8xf32>
    %cst_23 = arith.constant dense<0xFF800000> : vector<8xf32>
    %41 = vector.multi_reduction <maximumf>, %40, %cst_23 [1] : vector<8x8xf32> to vector<8xf32>
    %42 = vector.shape_cast %41 : vector<8xf32> to vector<8x1xf32>
    %43 = vector.broadcast %42 : vector<8x1xf32> to vector<8x8xf32>
    %44 = arith.subf %40, %43 : vector<8x8xf32>
    %45 = math.exp %44 : vector<8x8xf32>
    %cst_24 = arith.constant dense<0.000000e+00> : vector<8xf32>
    %46 = vector.multi_reduction <add>, %45, %cst_24 [1] : vector<8x8xf32> to vector<8xf32>
    %47 = vector.shape_cast %46 : vector<8xf32> to vector<8x1xf32>
    %48 = tpu.reciprocal %47 {approx = true} : vector<8x1xf32> -> vector<8x1xf32>
    %49 = vector.broadcast %48 : vector<8x1xf32> to vector<8x8xf32>
    %50 = arith.mulf %45, %49 : vector<8x8xf32>
    %51 = arith.truncf %50 : vector<8x8xf32> to vector<8x8xbf16>
    %c0_25 = arith.constant 0 : index
    %c1 = arith.constant 1 : index
    %c0_26 = arith.constant 0 : index
    %c0_27 = arith.constant 0 : index
    %52 = vector.load %arg14[%c0_25, %c1, %c0_26, %c0_27] : memref<1x4x8x8xbf16, #tpu.memory_space<vmem>>, vector<1x1x8x8xbf16>
    %53 = vector.shape_cast %52 : vector<1x1x8x8xbf16> to vector<8x8xbf16>
    %54 = vector.shape_cast %51 : vector<8x8xbf16> to vector<1x1x8x8xbf16>
    tpu.vector_store %arg14[%c0_25, %c1, %c0_26, %c0_27], %54 {strides = array<i32>} : memref<1x4x8x8xbf16, #tpu.memory_space<vmem>>, vector<1x1x8x8xbf16>,
    %55 = arith.truncf %50 : vector<8x8xf32> to vector<8x8xbf16>
    %cst_28 = arith.constant dense<0.000000e+00> : vector<8x16xf32>
    %56 = tpu.matmul %55, %39, %cst_28 {dimension_numbers = #tpu.dot_dimension_numbers<[1], [0], [0], [1], [0, 0, 1, 1], [], []>} : vector<8x8xbf16>, vector<8x16xbf16>, vector<8x16xf32> -> vector<8x16xf32>
    %57 = arith.truncf %56 : vector<8x16xf32> to vector<8x16xbf16>
    %c0_29 = arith.constant 0 : index
    %c16 = arith.constant 16 : index
    %58 = vector.load %arg17[%c0_29, %c16] : memref<8x64xbf16, #tpu.memory_space<vmem>>, vector<8x16xbf16>
    tpu.vector_store %arg17[%c0_29, %c16], %57 {strides = array<i32>} : memref<8x64xbf16, #tpu.memory_space<vmem>>, vector<8x16xbf16>,
    %59 = vector.extract_strided_slice %12 {offsets = [0, 32], sizes = [8, 16], strides = [1, 1]} : vector<8x64xbf16> to vector<8x16xbf16>
    %60 = vector.extract_strided_slice %13 {offsets = [0, 32], sizes = [8, 16], strides = [1, 1]} : vector<8x64xbf16> to vector<8x16xbf16>
    %61 = vector.extract_strided_slice %14 {offsets = [0, 32], sizes = [8, 16], strides = [1, 1]} : vector<8x64xbf16> to vector<8x16xbf16>
    %cst_30 = arith.constant dense<0.000000e+00> : vector<8x8xf32>
    %62 = tpu.matmul %59, %60, %cst_30 {dimension_numbers = #tpu.dot_dimension_numbers<[1], [1], [0], [0], [0, 0, 1, 0], [], []>} : vector<8x16xbf16>, vector<8x16xbf16>, vector<8x8xf32> -> vector<8x8xf32>
    %cst_31 = arith.constant dense<0xFF800000> : vector<8xf32>
    %63 = vector.multi_reduction <maximumf>, %62, %cst_31 [1] : vector<8x8xf32> to vector<8xf32>
    %64 = vector.shape_cast %63 : vector<8xf32> to vector<8x1xf32>
    %65 = vector.broadcast %64 : vector<8x1xf32> to vector<8x8xf32>
    %66 = arith.subf %62, %65 : vector<8x8xf32>
    %67 = math.exp %66 : vector<8x8xf32>
    %cst_32 = arith.constant dense<0.000000e+00> : vector<8xf32>
    %68 = vector.multi_reduction <add>, %67, %cst_32 [1] : vector<8x8xf32> to vector<8xf32>
    %69 = vector.shape_cast %68 : vector<8xf32> to vector<8x1xf32>
    %70 = tpu.reciprocal %69 {approx = true} : vector<8x1xf32> -> vector<8x1xf32>
    %71 = vector.broadcast %70 : vector<8x1xf32> to vector<8x8xf32>
    %72 = arith.mulf %67, %71 : vector<8x8xf32>
    %73 = arith.truncf %72 : vector<8x8xf32> to vector<8x8xbf16>
    %c0_33 = arith.constant 0 : index
    %c2 = arith.constant 2 : index
    %c0_34 = arith.constant 0 : index
    %c0_35 = arith.constant 0 : index
    %74 = vector.load %arg14[%c0_33, %c2, %c0_34, %c0_35] : memref<1x4x8x8xbf16, #tpu.memory_space<vmem>>, vector<1x1x8x8xbf16>
    %75 = vector.shape_cast %74 : vector<1x1x8x8xbf16> to vector<8x8xbf16>
    %76 = vector.shape_cast %73 : vector<8x8xbf16> to vector<1x1x8x8xbf16>
    tpu.vector_store %arg14[%c0_33, %c2, %c0_34, %c0_35], %76 {strides = array<i32>} : memref<1x4x8x8xbf16, #tpu.memory_space<vmem>>, vector<1x1x8x8xbf16>,
    %77 = arith.truncf %72 : vector<8x8xf32> to vector<8x8xbf16>
    %cst_36 = arith.constant dense<0.000000e+00> : vector<8x16xf32>
    %78 = tpu.matmul %77, %61, %cst_36 {dimension_numbers = #tpu.dot_dimension_numbers<[1], [0], [0], [1], [0, 0, 1, 1], [], []>} : vector<8x8xbf16>, vector<8x16xbf16>, vector<8x16xf32> -> vector<8x16xf32>
    %79 = arith.truncf %78 : vector<8x16xf32> to vector<8x16xbf16>
    %c0_37 = arith.constant 0 : index
    %c32 = arith.constant 32 : index
    %80 = vector.load %arg17[%c0_37, %c32] : memref<8x64xbf16, #tpu.memory_space<vmem>>, vector<8x16xbf16>
    tpu.vector_store %arg17[%c0_37, %c32], %79 {strides = array<i32>} : memref<8x64xbf16, #tpu.memory_space<vmem>>, vector<8x16xbf16>,
    %81 = vector.extract_strided_slice %12 {offsets = [0, 48], sizes = [8, 16], strides = [1, 1]} : vector<8x64xbf16> to vector<8x16xbf16>
    %82 = vector.extract_strided_slice %13 {offsets = [0, 48], sizes = [8, 16], strides = [1, 1]} : vector<8x64xbf16> to vector<8x16xbf16>
    %83 = vector.extract_strided_slice %14 {offsets = [0, 48], sizes = [8, 16], strides = [1, 1]} : vector<8x64xbf16> to vector<8x16xbf16>
    %cst_38 = arith.constant dense<0.000000e+00> : vector<8x8xf32>
    %84 = tpu.matmul %81, %82, %cst_38 {dimension_numbers = #tpu.dot_dimension_numbers<[1], [1], [0], [0], [0, 0, 1, 0], [], []>} : vector<8x16xbf16>, vector<8x16xbf16>, vector<8x8xf32> -> vector<8x8xf32>
    %cst_39 = arith.constant dense<0xFF800000> : vector<8xf32>
    %85 = vector.multi_reduction <maximumf>, %84, %cst_39 [1] : vector<8x8xf32> to vector<8xf32>
    %86 = vector.shape_cast %85 : vector<8xf32> to vector<8x1xf32>
    %87 = vector.broadcast %86 : vector<8x1xf32> to vector<8x8xf32>
    %88 = arith.subf %84, %87 : vector<8x8xf32>
    %89 = math.exp %88 : vector<8x8xf32>
    %cst_40 = arith.constant dense<0.000000e+00> : vector<8xf32>
    %90 = vector.multi_reduction <add>, %89, %cst_40 [1] : vector<8x8xf32> to vector<8xf32>
    %91 = vector.shape_cast %90 : vector<8xf32> to vector<8x1xf32>
    %92 = tpu.reciprocal %91 {approx = true} : vector<8x1xf32> -> vector<8x1xf32>
    %93 = vector.broadcast %92 : vector<8x1xf32> to vector<8x8xf32>
    %94 = arith.mulf %89, %93 : vector<8x8xf32>
    %95 = arith.truncf %94 : vector<8x8xf32> to vector<8x8xbf16>
    %c0_41 = arith.constant 0 : index
    %c3 = arith.constant 3 : index
    %c0_42 = arith.constant 0 : index
    %c0_43 = arith.constant 0 : index
    %96 = vector.load %arg14[%c0_41, %c3, %c0_42, %c0_43] : memref<1x4x8x8xbf16, #tpu.memory_space<vmem>>, vector<1x1x8x8xbf16>
    %97 = vector.shape_cast %96 : vector<1x1x8x8xbf16> to vector<8x8xbf16>
    %98 = vector.shape_cast %95 : vector<8x8xbf16> to vector<1x1x8x8xbf16>
    tpu.vector_store %arg14[%c0_41, %c3, %c0_42, %c0_43], %98 {strides = array<i32>} : memref<1x4x8x8xbf16, #tpu.memory_space<vmem>>, vector<1x1x8x8xbf16>,
    %99 = arith.truncf %94 : vector<8x8xf32> to vector<8x8xbf16>
    %cst_44 = arith.constant dense<0.000000e+00> : vector<8x16xf32>
    %100 = tpu.matmul %99, %83, %cst_44 {dimension_numbers = #tpu.dot_dimension_numbers<[1], [0], [0], [1], [0, 0, 1, 1], [], []>} : vector<8x8xbf16>, vector<8x16xbf16>, vector<8x16xf32> -> vector<8x16xf32>
    %101 = arith.truncf %100 : vector<8x16xf32> to vector<8x16xbf16>
    %c0_45 = arith.constant 0 : index
    %c48 = arith.constant 48 : index
    %102 = vector.load %arg17[%c0_45, %c48] : memref<8x64xbf16, #tpu.memory_space<vmem>>, vector<8x16xbf16>
    tpu.vector_store %arg17[%c0_45, %c48], %101 {strides = array<i32>} : memref<8x64xbf16, #tpu.memory_space<vmem>>, vector<8x16xbf16>,
    %c0_46 = arith.constant 0 : index
    %c0_47 = arith.constant 0 : index
    %103 = vector.load %arg17[%c0_46, %c0_47] : memref<8x64xbf16, #tpu.memory_space<vmem>>, vector<8x64xbf16>
    %c0_48 = arith.constant 0 : index
    %c0_49 = arith.constant 0 : index
    %104 = vector.load %arg11[%c0_48, %c0_49] : memref<64x32xbf16, #tpu.memory_space<vmem>>, vector<64x32xbf16>
    %cst_50 = arith.constant dense<0.000000e+00> : vector<8x32xf32>
    %105 = tpu.matmul %103, %104, %cst_50 {dimension_numbers = #tpu.dot_dimension_numbers<[1], [0], [0], [1], [0, 0, 1, 1], [], []>} : vector<8x64xbf16>, vector<64x32xbf16>, vector<8x32xf32> -> vector<8x32xf32>
    %c0_51 = arith.constant 0 : index
    %c0_52 = arith.constant 0 : index
    %106 = vector.load %arg12[%c0_51, %c0_52] : memref<1x32xf32, #tpu.memory_space<vmem>>, vector<1x32xf32>
    %107 = vector.broadcast %106 : vector<1x32xf32> to vector<8x32xf32>
    %108 = arith.addf %105, %107 : vector<8x32xf32>
    %c0_53 = arith.constant 0 : index
    %c0_54 = arith.constant 0 : index
    %c0_55 = arith.constant 0 : index
    %109 = vector.load %arg13[%c0_53, %c0_54, %c0_55] : memref<1x8x32xf32, #tpu.memory_space<vmem>>, vector<1x8x32xf32>
    %110 = vector.shape_cast %109 : vector<1x8x32xf32> to vector<8x32xf32>
    %111 = vector.shape_cast %108 : vector<8x32xf32> to vector<1x8x32xf32>
    tpu.vector_store %arg13[%c0_53, %c0_54, %c0_55], %111 {strides = array<i32>} : memref<1x8x32xf32, #tpu.memory_space<vmem>>, vector<1x8x32xf32>,
    return
  }
  func.func @transform_0(%arg0: i32, %arg1: i32) -> (i32, i32, i32) {
    %c0_i32 = arith.constant 0 : i32
    %c0_i32_0 = arith.constant 0 : i32
    return %arg0, %arg1, %c0_i32 : i32, i32, i32
  }
  func.func @transform_1(%arg0: i32, %arg1: i32) -> (i32, i32, i32) {
    %c0_i32 = arith.constant 0 : i32
    %c0_i32_0 = arith.constant 0 : i32
    %c0_i32_1 = arith.constant 0 : i32
    return %arg0, %c0_i32, %c0_i32_0 : i32, i32, i32
  }
  func.func @transform_2(%arg0: i32, %arg1: i32) -> (i32, i32, i32) {
    %c0_i32 = arith.constant 0 : i32
    %c0_i32_0 = arith.constant 0 : i32
    %c0_i32_1 = arith.constant 0 : i32
    return %arg0, %c0_i32, %c0_i32_0 : i32, i32, i32
  }
  func.func @transform_3(%arg0: i32, %arg1: i32) -> (i32, i32) {
    %c0_i32 = arith.constant 0 : i32
    %c0_i32_0 = arith.constant 0 : i32
    %c0_i32_1 = arith.constant 0 : i32
    return %c0_i32, %c0_i32_0 : i32, i32
  }
  func.func @transform_4(%arg0: i32, %arg1: i32) -> (i32, i32) {
    %c0_i32 = arith.constant 0 : i32
    %c0_i32_0 = arith.constant 0 : i32
    %c0_i32_1 = arith.constant 0 : i32
    return %c0_i32, %c0_i32_0 : i32, i32
  }
  func.func @transform_5(%arg0: i32, %arg1: i32) -> (i32, i32) {
    %c0_i32 = arith.constant 0 : i32
    %c0_i32_0 = arith.constant 0 : i32
    %c0_i32_1 = arith.constant 0 : i32
    return %c0_i32, %c0_i32_0 : i32, i32
  }
  func.func @transform_6(%arg0: i32, %arg1: i32) -> (i32, i32) {
    %c0_i32 = arith.constant 0 : i32
    %c0_i32_0 = arith.constant 0 : i32
    %c0_i32_1 = arith.constant 0 : i32
    return %c0_i32, %c0_i32_0 : i32, i32
  }
  func.func @transform_7(%arg0: i32, %arg1: i32) -> (i32, i32) {
    %c0_i32 = arith.constant 0 : i32
    %c0_i32_0 = arith.constant 0 : i32
    %c0_i32_1 = arith.constant 0 : i32
    return %c0_i32, %c0_i32_0 : i32, i32
  }
  func.func @transform_8(%arg0: i32, %arg1: i32) -> (i32, i32) {
    %c0_i32 = arith.constant 0 : i32
    %c0_i32_0 = arith.constant 0 : i32
    %c0_i32_1 = arith.constant 0 : i32
    return %c0_i32, %c0_i32_0 : i32, i32
  }
  func.func @transform_9(%arg0: i32, %arg1: i32) -> (i32, i32) {
    %c0_i32 = arith.constant 0 : i32
    %c0_i32_0 = arith.constant 0 : i32
    %c0_i32_1 = arith.constant 0 : i32
    return %c0_i32, %c0_i32_0 : i32, i32
  }
  func.func @transform_10(%arg0: i32, %arg1: i32) -> (i32, i32) {
    %c0_i32 = arith.constant 0 : i32
    %c0_i32_0 = arith.constant 0 : i32
    %c0_i32_1 = arith.constant 0 : i32
    return %c0_i32, %c0_i32_0 : i32, i32
  }
  func.func @transform_11(%arg0: i32, %arg1: i32) -> (i32, i32, i32) {
    %c0_i32 = arith.constant 0 : i32
    %c0_i32_0 = arith.constant 0 : i32
    return %arg0, %arg1, %c0_i32 : i32, i32, i32
  }
  func.func @transform_12(%arg0: i32, %arg1: i32) -> (i32, i32, i32, i32) {
    %c0_i32 = arith.constant 0 : i32
    %c0_i32_0 = arith.constant 0 : i32
    %c0_i32_1 = arith.constant 0 : i32
    return %arg0, %c0_i32, %arg1, %c0_i32_0 : i32, i32, i32, i32
  }
}

</mosaic_0001>

<bundles_post_ra>
// kernel: tpu_custom_call.1
= control target key start
LH: loop header
LB: loop body
LE: loop exit
PB: predicated region body
PF: predicated region fallthrough
CT: control target
= control target key end

     0   :  { %s2092_s0 = inlined_call_operand.hbm [shape: bf16[2,8,32], index: 0, kind: input, shape index: {}]   ;;  %s2093_s1 = inlined_call_operand.hbm [shape: bf16[2,8,64], index: 1, kind: input, shape index: {}]   ;;  %s2094_s2 = inlined_call_operand.hbm [shape: bf16[2,8,64], index: 2, kind: input, shape index: {}]   ;;  %s2095_s3 = inlined_call_operand.vmem [shape: bf16[32,64], index: 3, kind: input, shape index: {}]   ;;  %s2096_s4 = inlined_call_operand.vmem [shape: f32[1,64], index: 4, kind: input, shape index: {}]   ;;  %s2097_s5 = inlined_call_operand.vmem [shape: bf16[64,64], index: 5, kind: input, shape index: {}]   ;;  %s2098_s6 = inlined_call_operand.vmem [shape: f32[1,64], index: 6, kind: input, shape index: {}]   ;;  %s2099_s7 = inlined_call_operand.hbm [shape: bf16[64,64], index: 7, kind: input, shape index: {}]   ;;  %s2100_s8 = inlined_call_operand.vmem [shape: f32[1,64], index: 8, kind: input, shape index: {}]   ;;  %s2101_s9 = inlined_call_operand.vmem [shape: bf16[64,32], index: 9, kind: input, shape index: {}]   ;;  %s2102_s10 = inlined_call_operand.vmem [shape: f32[1,32], index: 10, kind: input, shape index: {}]   ;;  %s2103_s11 = inlined_call_operand.hbm [shape: f32[2,8,32], index: 11, kind: output, shape index: {0}]   ;;  %s2104_s12 = inlined_call_operand.hbm [shape: bf16[2,4,8,8], index: 12, kind: output, shape index: {1}]  }
   0x1   :  { %2118 = sst [smem:[#allocation29_spill]] %s2092_s0 }
   0x2   :  { %2119 = sst [smem:[#allocation30_spill]] %s2093_s1 }
   0x3   :  { %2120 = sst [smem:[#allocation31_spill]] %s2099_s7 }
   0x4   :  { %2121 = sst [smem:[#allocation32_spill]] %s2101_s9 }
   0x5   :  { %2122 = sst [smem:[#allocation33_spill]] %s2102_s10 }
   0x6   :  { %2123 = sst [smem:[#allocation34_spill]] %s2103_s11 }
   0x7   :  { %2124 = sst [smem:[#allocation35_spill]] %s2104_s12 }
   0x8   :  { %18 = vsyncpa [#allocation6], 0 }
   0x9   :  { %20 = vsyncpa [#allocation6 + $0x1], 0 }
   0xa   :  { %21 = vsyncpa [#allocation9], 0 }
   0xb   :  { %23 = vsyncpa [#allocation9 + $0x1], 0 }
   0xc   :  { %24 = vsyncpa [#allocation12], 0 }
   0xd   :  { %25 = vsyncpa [#allocation7], 0 }
   0xe   :  { %27 = vsyncpa [#allocation7 + $0x1], 0 }
   0xf   :  { %28 = vsyncpa [#allocation15], 0 }
  0x10   :  { %30 = vsyncpa [#allocation15 + $0x1], 0  ;;  %s1786_s21 = smov 0   ;;  %s1788_s22 = smov 0  }
  0x11   :  { %s1790_s23 = smov 0   ;;  %s1792_s24 = smov 0  }
  0x12   :  { %s1794_s25 = smov 0   ;;  %s1796_s26 = smov 0  }
  0x13 LB: > { %2125 = sst [smem:[#allocation21_spill]] %s1688_s21  ;;  %s1817_s27 = sadd.s32 4294967295, %s1708_s26   ;;  %s1708_s26 = sphi %s1796_s26, %s36_s26   ;;  %s1704_s25 = sphi %s1794_s25, %s2155_s25   ;;  %s1700_s24 = sphi %s1792_s24, %s2154_s24   ;;  %s1696_s23 = sphi %s1790_s23, %s2158_s23   ;;  %s1692_s22 = sphi %s1788_s22, %s2157_s22   ;;  %s1688_s21 = sphi %s1786_s21, %s2156_s21  }
  0x14   : > { %2126 = sst [smem:[#allocation22_spill]] %s1700_s24  ;;  %s1238_s28 = sadd.s32 4294967294, %s1708_s26  }
  0x15   : > { %2127 = sst [smem:[#allocation23_spill]] %s1704_s25  ;;  %s48_s29 = sadd.s32 1, %s1704_s25 }
  0x16   : > { %2128 = sst [smem:[#allocation24_spill]] %s1708_s26  ;;  %s57_s30 = sadd.s32 1, %s1696_s23 }
  0x17   : > { %p50_p0 = scmp.ge.s32.totalorder %s48_s29, 2  ;;  %p64_p1 = scmp.ne.s32.totalorder %s1696_s23, %s1692_s22 }
  0x18   : > { %p65_p2 = scmp.eq.s32.totalorder %s1708_s26, 0  ;;  %p70_p3 = scmp.ne.s32.totalorder %s1692_s22, %s1688_s21 }
  0x19   : > { %s2160_s29 = smov (%p50_p0, %s48_s29), 0  ;;  %p316_p5 = scmp.eq.s32.totalorder %s1817_s27, 1 }
  0x1a   : > { %2129 = sst [smem:[#allocation25_spill]] %s2160_s29  ;;  %p1829_p4 = por %p65_p2, %p64_p1 }
  0x1b   : > { %s52_s14 = ssub.s32 %s1704_s25, %s2160_s29  ;;  %p322_p6 = scmp.eq.s32.totalorder %s1238_s28, 1 }
  0x1c   : > { %p55_p7 = scmp.eq.s32.totalorder %s52_s14, 0  ;;  %p1836_p8 = por %p316_p5, %p64_p1 }
  0x1d   : > { %p1843_p9 = por %p322_p6, %p70_p3  ;;  %p1241_p10 = scmp.ge.s32.totalorder %s1708_s26, 2 }
  0x1e   : > { %s2131_s15 = scalar_select %p1836_p8, 1, 0 }
  0x1f   : > { %s2133_s16 = scalar_select %p1843_p9, 1, 0 }
  0x20   : > { %2132 = sst [smem:[#allocation26_spill]] %s2131_s15  ;;  %p1384_p11 = scmp.lt.s32.totalorder %s1708_s26, 2 }
  0x21   : > { %2134 = sst [smem:[#allocation27_spill]] %s2133_s16  ;;  %s2108_s18 = sand.u32 1, %s1696_s23  }
  0x22   : > { %s1848_s17 = scalar_select %p55_p7, %s1696_s23, %s57_s30  }
  0x23   : > { %s1854_s19 = sshll.u32 %s1704_s25, 2  ;;  %s1858_s20 = sshll.u32 %s2108_s18, 2 }
  0x24   : > { %2135 = sst [smem:[#allocation28_spill]] %s1848_s17  ;;  %p1862_p12 = pnand %p1384_p11, %p1829_p4 }
  0x25   : > { %s425_s30 = sand.u32 1, %s1708_s26   ;;  %s2137_s1 = sld [smem:[#allocation30_spill]] }
  0x26   : > { %s429_s16 = scalar_lea.vmem [#allocation8], %s1858_s20  ;;  %s1872_s18 = scalar_lea.sflag [#allocation9], %s425_s30 }
  0x27   : > { %s437_s10 = sshll.u32 %s429_s16, 4  ;;  %p71_p13 = scmp.eq.s32.totalorder %s1817_s27, 0  ;;  %s438_s10 = int_to_ptr.vmem [resolvable:$true] %s437_s10 }
  0x28   : > { %p1239_p0 = scmp.ge.s32.totalorder %s1708_s26, 1  ;;  %p357_p1 = scmp.lt.s32.totalorder %s1708_s26, 3 }
  0x29   : > { %p1885_p2 = por %p71_p13, %p70_p3  ;;  %s2139_s7 = sld [smem:[#allocation31_spill]] }
  0x2a   : > { %p1892_p4 = pnand %p1239_p0, %p357_p1  ;;  %s2141_s0 = sld [smem:[#allocation29_spill]] }
  0x2b   : > { %s433_s17 = scalar_lea.hbm %s2137_s1, %s1854_s19  ;;  %s1712_s26 = smov 4  }
  0x2c   : > { %s435_s25 = sshll.u32 %s433_s17, 4  ;;  %p1362_p5 = pneg %p1892_p4  ;;  %s436_s25 = int_to_ptr.hbm [resolvable:$true] %s435_s25 }
  0x2d   : > { %1372 = dma.hbm_to_vmem [thread:$0]  (!%p1862_p12), %s436_s25, 64, %s438_s10, %s1872_s18  }
  0x2e   : > { %s1710_s10 = smov [#allocation11]   ;;  %p1363_p3 = pnand %p1362_p5, %p71_p13 }
  0x2f   : > { %s380_s17 = sshll.u32 %s2139_s7, 4  ;;  %s382_s25 = sshll.u32 %s1710_s10, 4  ;;  %s381_s17 = int_to_ptr.hbm [resolvable:$true] %s380_s17  ;;  %s383_s25 = int_to_ptr.vmem [resolvable:$true] %s382_s25 }
  0x30   : > { %s414_s16 = scalar_lea.hbm %s2141_s0, %s1854_s19  ;;  %s1711_s7 = smov 64  }
  0x31   : > { %s416_s1 = sshll.u32 %s414_s16, 4  ;;  %s409_s21 = scalar_lea.vmem [#allocation5], %s1858_s20  ;;  %s417_s1 = int_to_ptr.hbm [resolvable:$true] %s416_s1 }
  0x32   : > { %1365 = dma.hbm_to_vmem [thread:$0]  (!%p1363_p3), %s381_s17, 512, %s383_s25, [#allocation12], %s1711_s7, %s1711_s7, %s1712_s26  }
  0x33   : > { %s418_s11 = sshll.u32 %s409_s21, 4  ;;  %s2142_s12 = sand.u32 1, %s1696_s23   ;;  %s419_s11 = int_to_ptr.vmem [resolvable:$true] %s418_s11 }
  0x34   : > { %s406_s15 = scalar_lea.sflag [#allocation6], %s2142_s12  ;;  %s452_s9 = scalar_lea.hbm %s2094_s2, %s1854_s19 }
  0x35   : > { %1369 = dma.hbm_to_vmem [thread:$0]  (!%p1862_p12), %s417_s1, 64, %s419_s11, %s406_s15  }
  0x36   : > { %s448_s14 = scalar_lea.vmem [#allocation10], %s1858_s20  ;;  %s454_s16 = sshll.u32 %s452_s9, 4  ;;  %s455_s16 = int_to_ptr.hbm [resolvable:$true] %s454_s16 }
  0x37   : > { %s456_s13 = sshll.u32 %s448_s14, 4  ;;  %465 = sbr.rel (%p1892_p4) target bundleno = 1133 (0x46d), region = 64  ;;  %s457_s13 = int_to_ptr.vmem [resolvable:$true] %s456_s13 }
  0x38   : > { %1375 = dma.hbm_to_vmem [thread:$0]  (!%p1862_p12), %s455_s16, 64, %s457_s13, %s1872_s18  }
  0x39   : > { %s1920_s7 = sand.u32 (!%p1892_p4), 1, %s1692_s22  }
  0x3a   : > { %s1923_s1 = sshll.u32 (!%p1892_p4), %s1920_s7, 2  ;;  %s468_s11 = scalar_lea.sflag (!%p1892_p4), [#allocation6], %s1920_s7 }
  0x3b   : > { %s471_s12 = scalar_lea.vmem (!%p1892_p4), [#allocation5], %s1923_s1 }
  0x3c   : > { %1667 = dma.done.wait (%p1885_p2), %s468_s11, 64  }
  0x3d   : > { %1669 = vsyncadd (%p1885_p2), %s468_s11, 4294967232  ;;  %s477_s9 = sand.u32 1, %s1817_s27   ;;  %s481_s24 = scalar_lea.vmem [#allocation8], %s1923_s1 }
  0x3e   : > { %s478_s21 = scalar_lea.sflag [#allocation9], %s477_s9 }
  0x3f   : > { %1671 = dma.done.wait (%p1885_p2), %s478_s21, 128  }
  0x40   : > { %1673 = vsyncadd (%p1885_p2), %s478_s21, 4294967168  ;;  %s491_s26 = scalar_lea.vmem [#allocation10], %s1923_s1 }
  0x41   : > { %1675 = dma.done.wait (%p71_p13), [#allocation12], 512  }
  0x42   : > { %1677 = vsyncadd (%p71_p13), [#allocation12], 4294966784  ;;  %v1336_v0 = vld [vmem:[%s2097_s5 + $0x18] sm:$0xff]  ;;  %v1342_v1 = vld [vmem:[%s2095_s3 + $0x8] sm:$0xff]  ;;  %vm691_vm0 = vcmask 261120   ;;  %vm595_vm1 = vcmask 523264  }
  0x43   : > { %603 = vmatpush.bf16.msra.mxu0 %v1336_v0  ;;  %v1335_v2 = vld [vmem:[%s2097_s5 + $0x10] sm:$0xff]  ;;  %701 = vmatpush.bf16.msra.mxu2 %v1342_v1  ;;  %v1341_v3 = vld [vmem:[%s2095_s3] sm:$0xff]  ;;  %v1334_v4 = vld [vmem:[%s2097_s5 + $0x8] sm:$0xff]  ;;  %vm666_vm2 = vcmask 519168   ;;  %vm712_vm3 = vcmask 130048   ;;  %s1713_s9 = smov 96  }
  0x44   : > { %v670_v5 = vld [vmem:[%s471_s12] sm:$0xf]  ;;  %v1333_v6 = vld [vmem:[%s2097_s5] sm:$0xff]  ;;  %v558_v7 = vld [vmem:[%s481_s24] sm:$0xf]  ;;  %s1714_s21 = smov 112  }
  0x45   : > { %v1340_v8 = vld [vmem:[#allocation11 + $0x18] sm:$0xff]  ;;  %v1339_v9 = vld [vmem:[#allocation11 + $0x10] sm:$0xff]  ;;  %v1338_v13 = vld [vmem:[#allocation11 + $0x8] sm:$0xff]  ;;  %s1715_s24 = smov 80   ;;  %vm732_vm4 = vcmask 64512   ;;  %vm750_vm5 = vcmask 1043456  }
  0x46   : > { %656 = vmatpush.bf16.msra.mxu1 %v1340_v8  ;;  %v1447_v10 = vld [vmem:[%s2096_s4] ss:$0 sm:$0xff]  ;;  %v1337_v28 = vld [vmem:[#allocation11] sm:$0xff]  ;;  %s1254_s15 = sshll.u32 %s1920_s7, 4  ;;  %vm745_vm6 = vcmask 60416   ;;  %vm768_vm7 = vcmask 125952  }
  0x47   : > { %604 = vmatpush.bf16.msra.mxu0 %v1335_v2  ;;  %702 = vmatpush.bf16.msra.mxu2 %v1341_v3  ;;  %v1446_v11 = vld [vmem:[%s2098_s6] ss:$0 sm:$0xff]  ;;  %s2000_s18 = scalar_lea.vmem [#allocation14], %s1254_s15  ;;  %s1716_s19 = smov 16   ;;  %vm842_vm8 = vcmask 257152   ;;  %vm907_vm9 = vcmask 388352  }
  0x48   : > { %v612_v29 = vld [vmem:[%s491_s26] sm:$0xf]  ;;  %s1717_s20 = smov 32   ;;  %s1718_s28 = smov 48   ;;  %vm972_vm10 = vcmask 519552  }
  0x49   : > { %v1448_v42 = vld [vmem:[%s2100_s8] ss:$0 sm:$0xff]  ;;  %s2143_s30 = sld [smem:[#allocation32_spill]]  ;;  %s1063_s15 = sshll.u32 %s2000_s18, 4  ;;  %s1064_s15 = int_to_ptr.vmem [resolvable:$true] %s1063_s15 }
  0x4a   : > { %1297 = vmatmul.msk.bf16.vlgmr.msra.gmra.mxu2 %vm691_vm0, %v670_v5  ;;  %657 = vmatpush.bf16.msra.mxu1 %v1339_v9  ;;  %s2144_s27 = sld [smem:[#allocation22_spill]] }
  0x4b   : > { %605 = vmatpush.bf16.msra.mxu0 %v1334_v4  ;;  %s2146_s1 = sld [smem:[#allocation35_spill]] }
  0x4e   : > { %658 = vmatpush.bf16.msra.mxu1 %v1338_v13 }
  0x4f   : > { %606 = vmatpush.bf16.msra.mxu0 %v1333_v6 }
  0x51   : > { %s1606_s10 = scalar_lea.hbm %s2146_s1, 32 }
  0x52   : > { %1271 = vmatmul.msk.bf16.vlgmr.msra.gmra.mxu0 %vm595_vm1, %v558_v7  ;;  %659 = vmatpush.bf16.msra.mxu1 %v1337_v28 }
  0x55   : > { %1288 = vmatmul.msk.bf16.vlgmr.msra.gmra.mxu1 %vm595_vm1, %v612_v29 }
  0xcd   : > { %v704_v12 = vpop.f32.mrf.mxu2 }
  0xce   : > { %v705_v15 = vadd.f32 %v1447_v10, %v704_v12 }
  0xcf   : > { %v608_v14 = vpop.f32.mrf.mxu0 }
  0xd0   : > { %v609_v16 = vadd.f32 %v1446_v11, %v608_v14  ;;  %v708_v17 = vmul.f32 0.25, %v705_v15 }
  0xd2   : > { %v665_v18 = vpack.c.bf16 %v609_v16, %v609_v16  ;;  %v709_v19 = vpack.c.bf16 %v708_v17, %v708_v17  ;;  %v661_v43 = vpop.f32.mrf.mxu1 }
  0xd3   : > { %v662_v44 = vadd.f32 %v1448_v42, %v661_v43 }
  0xd4   : > { %667 = vst.msk [vmem:[#allocation2] sm:$0xf] %vm666_vm2, %v665_v18  ;;  %v771_v20 = vunpack.c.l.b16 %v709_v19 }
  0xd5   : > { %v706_v21 = vpop.f32.mrf.mxu2  ;;  %v668_v45 = vpack.c.bf16 %v662_v44, %v662_v44 }
  0xd6   : > { %v772_v23 = vpack.c.b16 %v771_v20, %v771_v20 }
  0xd7   : > { %v610_v22 = vpop.f32.mrf.mxu0  ;;  %669 = vst.msk [vmem:[#allocation3] sm:$0xf] %vm666_vm2, %v668_v45 }
  0xd8   : > { %844 = vrot.lane.b32.xlu2 %v772_v23, %s1713_s9 }
  0xda   : > { %v663_v46 = vpop.f32.mrf.mxu1 }
  0xdb   : > { %v710_v24 = vld [vmem:[#allocation2] sm:$0xf] }
  0xdc   : > { %v717_v25 = vsel %vm712_vm3, %v710_v24, 0  ;;  %v776_v26 = vunpack.c.l.b16 %v710_v24 }
  0xdd   : > { %726 = vmatpush.bf16.xpose.msra.mxu3 %v717_v25 }
  0xde   : > { %v777_v27 = vpack.c.b16 %v776_v26, %v776_v26  ;;  %v711_v47 = vld [vmem:[#allocation3] sm:$0xf] }
  0xdf   : > { %v752_v48 = vsel %vm750_vm5, %v711_v47, 0  ;;  %v814_v63 = vunpack.c.l.b16 %v711_v47 }
  0xe0   : > { %846 = vrot.lane.b32.xlu1 %v777_v27, %s1713_s9  ;;  %778 = vrot.lane.b32.xlu0 %v777_v27, %s1714_s21 }
  0xe1   : > { %909 = vrot.lane.b32.xlu2 %v772_v23, %s1715_s24  ;;  %761 = vmatpush.bf16.msrb.mxu2 %v752_v48  ;;  %v815_v0 = vpack.c.b16 %v814_v63, %v814_v63 }
  0xe4   : > { %1298 = vmatmul.msk.bf16.vlgmr.msra.gmra.mxu3 %vm712_vm3, %v709_v19 }
  0xe8   : > { %911 = vrot.lane.b32.xlu1 %v777_v27, %s1715_s24  ;;  %773 = vrot.lane.b32.xlu0 %v772_v23, %s1714_s21 }
 0x132   : > { %v845_v34 = vpop.permute.xlu2 %844 }
 0x13b   : > { %v910_v40 = vpop.permute.xlu2 %909 }
 0x152   : > { %v847_v30 = vpop.permute.xlu1 %846  ;;  %v779_v31 = vpop.permute.xlu0 %778 }
 0x153   : > { %v784_v32 = vsel %vm712_vm3, %v779_v31, 0  ;;  %v852_v33 = vsel %vm712_vm3, %v847_v30, 0 }
 0x154   : > { %793 = vmatpush.bf16.xpose.msrb.mxu3 %v784_v32  ;;  %861 = vmatpush.bf16.xpose.msrb.mxu1 %v852_v33 }
 0x15a   : > { %v912_v35 = vpop.permute.xlu1 %911  ;;  %v774_v36 = vpop.permute.xlu0 %773 }
 0x15b   : > { %v917_v37 = vsel %vm712_vm3, %v912_v35, 0  ;;  %1300 = vmatmul.msk.bf16.vlgmr.msrb.gmra.mxu3 %vm712_vm3, %v774_v36  ;;  %1303 = vmatmul.msk.bf16.vlgmr.msrb.gmra.mxu1 %vm712_vm3, %v845_v34 }
 0x15c   : > { %926 = vmatpush.bf16.xpose.msra.mxu3 %v917_v37 }
 0x167   : > { %v728_v38 = vpop.f32.mrf.mxu3 }
 0x168   : > { %v733_v39 = vsel %vm732_vm4, %v728_v38, -inf }
 0x169   : > { %734 = vmax.xlane.f32.xlu0 %v733_v39 }
 0x16b   : > { %1306 = vmatmul.msk.bf16.vlgmr.msra.gmra.mxu3 %vm712_vm3, %v910_v40 }
 0x16f   : > { %v730_v41 = vpop.f32.mrf.mxu3 }
 0x1d8   : > { %v863_v49 = vpop.f32.mrf.mxu1 }
 0x1d9   : > { %v867_v50 = vsel %vm732_vm4, %v863_v49, -inf }
 0x1da   : > { %868 = vmax.xlane.f32.xlu2 %v867_v50  ;;  %v1346_v50 = vld [vmem:[%s2143_s30 + $0x18] sm:$0xff] }
 0x1db   : > { %1019 = vmatpush.bf16.msra.mxu1 %v1346_v50 }
 0x1dc   : > { %v735_v51 = vpop.xlane.xlu0 %734 }
 0x1dd   : > { %v736_v52 = vsub.f32 %v728_v38, %v735_v51 }
 0x1de   : > { %v795_v53 = vpop.f32.mrf.mxu3 }
 0x1df   : > { %v737_v54 = vmul.f32 1.442695, %v736_v52  ;;  %v799_v55 = vsel %vm732_vm4, %v795_v53, -inf  ;;  %v1345_v52 = vld [vmem:[%s2143_s30 + $0x10] sm:$0xff] }
 0x1e0   : > { %v865_v56 = vpop.f32.mrf.mxu1  ;;  %800 = vmax.xlane.f32.xlu1 %v799_v55  ;;  %1020 = vmatpush.bf16.msra.mxu1 %v1345_v52 }
 0x1e1   : > { %1450 = vpow2.f32 %v737_v54  ;;  %v1343_v54 = vld [vmem:[%s2143_s30] sm:$0xff] }
 0x1e6   : > { %v797_v57 = vpop.f32.mrf.mxu3 }
 0x1e7   : > { %v1451_v58 = vpop.eup %1450 }
 0x1e8   : > { %v739_v59 = vsel %vm732_vm4, %v1451_v58, 0.0 }
 0x1e9   : > { %740 = vadd.xlane.f32.xlu0 %v739_v59 }
 0x1ee   : > { %v928_v60 = vpop.f32.mrf.mxu3 }
 0x1ef   : > { %v932_v61 = vsel %vm732_vm4, %v928_v60, -inf }
 0x1f0   : > { %933 = vmax.xlane.f32.xlu2 %v932_v61 }
 0x1f6   : > { %v930_v62 = vpop.f32.mrf.mxu3 }
 0x208   : > { %816 = vrot.lane.b32.xlu2 %v815_v0, %s1714_s21 }
 0x24d   : > { %v869_v1 = vpop.xlane.xlu2 %868 }
 0x24e   : > { %v870_v2 = vsub.f32 %v863_v49, %v869_v1 }
 0x250   : > { %v871_v3 = vmul.f32 1.442695, %v870_v2 }
 0x252   : > { %1452 = vpow2.f32 %v871_v3 }
 0x253   : > { %v801_v4 = vpop.xlane.xlu1 %800 }
 0x254   : > { %v802_v5 = vsub.f32 %v795_v53, %v801_v4  ;;  %v1344_v53 = vld [vmem:[%s2143_s30 + $0x8] sm:$0xff] }
 0x255   : > { %1021 = vmatpush.bf16.msra.mxu1 %v1344_v53 }
 0x256   : > { %v803_v6 = vmul.f32 1.442695, %v802_v5 }
 0x258   : > { %v1453_v7 = vpop.eup %1452  ;;  %1454 = vpow2.f32 %v803_v6 }
 0x259   : > { %v873_v8 = vsel %vm732_vm4, %v1453_v7, 0.0  ;;  %1022 = vmatpush.bf16.msra.mxu1 %v1343_v54 }
 0x25a   : > { %874 = vadd.xlane.f32.xlu0 %v873_v8 }
 0x25c   : > { %v741_v9 = vpop.xlane.xlu0 %740 }
 0x25d   : > { %1456 = vrcp.f32 %v741_v9 }
 0x25e   : > { %v1455_v10 = vpop.eup %1454 }
 0x25f   : > { %v805_v11 = vsel %vm732_vm4, %v1455_v10, 0.0 }
 0x260   : > { %806 = vadd.xlane.f32.xlu1 %v805_v11 }
 0x263   : > { %v1457_v12 = vpop.eup %1456  ;;  %v934_v13 = vpop.xlane.xlu2 %933 }
 0x264   : > { %v743_v14 = vmul.f32 %v1457_v12, %v1451_v58  ;;  %v935_v15 = vsub.f32 %v928_v60, %v934_v13 }
 0x266   : > { %v936_v16 = vmul.f32 1.442695, %v935_v15  ;;  %v744_v17 = vpack.c.bf16 %v743_v14, %v743_v14 }
 0x268   : > { %1458 = vpow2.f32 %v936_v16  ;;  %746 = vst.msk [vmem:[%s2000_s18] sm:$0xf] %vm745_vm6, %v744_v17  ;;  %1299 = vmatmul.msk.bf16.vlgmr.msrb.gmra.mxu2 %vm732_vm4, %v744_v17 }
 0x26b   : > { %v817_v18 = vpop.permute.xlu2 %816 }
 0x26c   : > { %v822_v19 = vsel %vm750_vm5, %v817_v18, 0 }
 0x26d   : > { %831 = vmatpush.bf16.msrb.mxu0 %v822_v19 }
 0x26e   : > { %v1459_v20 = vpop.eup %1458  ;;  %881 = vrot.lane.b32.xlu0 %v815_v0, %s1713_s9  ;;  %s1347_s9 = sshll.u32 %s2144_s27, 4 }
 0x26f   : > { %v938_v21 = vsel %vm732_vm4, %v1459_v20, 0.0  ;;  %s1062_s26 = scalar_lea.hbm %s2146_s1, %s1347_s9 }
 0x270   : > { %939 = vadd.xlane.f32.xlu1 %v938_v21 }
 0x289   : > { %946 = vrot.lane.b32.xlu1 %v815_v0, %s1715_s24 }
 0x2cd   : > { %v875_v22 = vpop.xlane.xlu0 %874 }
 0x2ce   : > { %1460 = vrcp.f32 %v875_v22 }
 0x2d3   : > { %v807_v23 = vpop.xlane.xlu1 %806 }
 0x2d4   : > { %v1461_v24 = vpop.eup %1460  ;;  %1462 = vrcp.f32 %v807_v23 }
 0x2d5   : > { %v877_v25 = vmul.f32 %v1461_v24, %v1453_v7 }
 0x2d7   : > { %v878_v26 = vpack.c.bf16 %v877_v25, %v877_v25 }
 0x2d9   : > { %1304 = vst.msk [vmem:[%s2000_s18 + $0x8] sm:$0xf] %vm745_vm6, %v878_v26 }
 0x2da   : > { %v1463_v27 = vpop.eup %1462 }
 0x2db   : > { %v809_v28 = vmul.f32 %v1463_v27, %v1455_v10 }
 0x2dd   : > { %v810_v29 = vpack.c.bf16 %v809_v28, %v809_v28 }
 0x2df   : > { %1301 = vst.msk [vmem:[%s2000_s18 + $0x4] sm:$0xf] %vm745_vm6, %v810_v29  ;;  %1302 = vmatmul.msk.bf16.vlgmr.msrb.gmra.mxu0 %vm732_vm4, %v810_v29 }
 0x2e0   : > { %v882_v30 = vpop.permute.xlu0 %881 }
 0x2e1   : > { %v887_v31 = vsel %vm750_vm5, %v882_v30, 0 }
 0x2e2   : > { %896 = vmatpush.bf16.msra.mxu2 %v887_v31 }
 0x2e3   : > { %v940_v32 = vpop.xlane.xlu1 %939 }
 0x2e4   : > { %1464 = vrcp.f32 %v940_v32 }
 0x2e5   : > { %1305 = vmatmul.msk.bf16.vlgmr.msra.gmra.mxu2 %vm732_vm4, %v878_v26 }
 0x2ea   : > { %v1465_v33 = vpop.eup %1464 }
 0x2eb   : > { %v942_v34 = vmul.f32 %v1465_v33, %v1459_v20  ;;  %v763_v35 = vpop.f32.mrf.mxu2 }
 0x2ec   : > { %v767_v36 = vpack.c.bf16 %v763_v35, %v763_v35 }
 0x2ed   : > { %v943_v37 = vpack.c.bf16 %v942_v34, %v942_v34 }
 0x2ee   : > { %769 = vst.msk [vmem:[#allocation4] sm:$0xf] %vm768_vm7, %v767_v36 }
 0x2ef   : > { %1307 = vst.msk [vmem:[%s2000_s18 + $0xc] sm:$0xf] %vm745_vm6, %v943_v37 }
 0x2f3   : > { %v765_v38 = vpop.f32.mrf.mxu2 }
 0x2fb   : > { %v947_v39 = vpop.permute.xlu1 %946 }
 0x2fc   : > { %v952_v40 = vsel %vm750_vm5, %v947_v39, 0 }
 0x2fd   : > { %961 = vmatpush.bf16.msra.mxu0 %v952_v40 }
 0x300   : > { %1308 = vmatmul.msk.bf16.vlgmr.msra.gmra.mxu0 %vm732_vm4, %v943_v37 }
 0x35c   : > { %v833_v41 = vpop.f32.mrf.mxu0 }
 0x35d   : > { %v837_v42 = vpack.c.bf16 %v833_v41, %v833_v41 }
 0x35f   : > { %839 = vrot.lane.b32.xlu2 %v837_v42, %s1716_s19  ;;  %s1065_s19 = sshll.u32 %s1062_s26, 4  ;;  %s1066_s19 = int_to_ptr.hbm [resolvable:$true] %s1065_s19 }
 0x364   : > { %v835_v43 = vpop.f32.mrf.mxu0 }
 0x368   : > { %v898_v44 = vpop.f32.mrf.mxu2 }
 0x369   : > { %v902_v45 = vpack.c.bf16 %v898_v44, %v898_v44 }
 0x36b   : > { %904 = vrot.lane.b32.xlu0 %v902_v45, %s1717_s20  ;;  %s1035_s20 = scalar_lea.sflag [#allocation15], %s1920_s7 }
 0x370   : > { %v900_v46 = vpop.f32.mrf.mxu2 }
 0x37d   : > { %v963_v47 = vpop.f32.mrf.mxu0 }
 0x37e   : > { %v967_v48 = vpack.c.bf16 %v963_v47, %v963_v47 }
 0x380   : > { %969 = vrot.lane.b32.xlu2 %v967_v48, %s1718_s28  ;;  %s1600_s28 = sshra.s32 %s1066_s19, 4  ;;  %s1601_s28 = int_to_ptr.hbm [resolvable:$true] %s1600_s28 }
 0x381   : > { %s1602_s29 = scalar_lea.hbm %s1601_s28, 16  ;;  %p1607_p12 = scmp.lt.s32.totalorder %s1601_s28, %s2146_s1 }
 0x382   : > { %p1603_p6 = scmp.ne.s32.totalorder %s1601_s28, %s1602_s29  ;;  %p1608_p13 = scmp.lt.s32.totalorder %s1606_s10, %s1602_s29 }
 0x384   : > { %p1604_p7 = pnand %p1603_p6, %p1836_p8  ;;  %p1609_p0 = por %p1608_p13, %p1607_p12 }
 0x385   : > { %v965_v49 = vpop.f32.mrf.mxu0 }
 0x386   : > { %p1605_p11 = pneg %p1604_p7 }
 0x388   : > { %p1610_p1 = pnand %p1609_p0, %p1605_p11 }
 0x3b9   : > { %v840_v51 = vpop.permute.xlu2 %839 }
 0x3ba   : > { %843 = vst.msk [vmem:[#allocation4] sm:$0xf] %vm842_vm8, %v840_v51 }
 0x3da   : > { %v970_v56 = vpop.permute.xlu2 %969 }
 0x3dd   : > { %v905_v55 = vpop.permute.xlu0 %904 }
 0x3de   : > { %908 = vst.msk [vmem:[#allocation4] sm:$0xf] %vm907_vm9, %v905_v55 }
 0x3df   : > { %973 = vst.msk [vmem:[#allocation4] sm:$0xf] %vm972_vm10, %v970_v56 }
 0x3e6   : > { %v974_v57 = vld [vmem:[#allocation4] sm:$0xf] }
 0x3e7   : > { %1325 = vmatmul.msk.bf16.vlgmr.msra.gmra.mxu1 %vm595_vm1, %v974_v57 }
 0x3e8   : > { %1613 = shalt.err (!%p1610_p1)
}
 0x3e9   : > { %s1719_s18 = smov 64   ;;  %s1720_s16 = smov 4  }
 0x3ea   : > { %1359 = dma.vmem_to_hbm [thread:$0]  (%p1836_p8), %s1064_s15, 256, %s1066_s19, %s1035_s20, %s1719_s18, %s1719_s18, %s1720_s16  }
 0x3eb   : > { %s1328_s11 = sshll.u32 %s2144_s27, 3  ;;  %s1253_s9 = sshll.u32 %s1920_s7, 3 }
 0x3ec   : > { %s2147_s26 = sld [smem:[#allocation34_spill]]  ;;  %s545_s14 = scalar_lea.vmem [#allocation13], %s1253_s9 }
 0x3ed   : > { %s2149_s10 = sld [smem:[#allocation33_spill]]  ;;  %s1048_s13 = sshll.u32 %s545_s14, 4  ;;  %s1049_s13 = int_to_ptr.vmem [resolvable:$true] %s1048_s13 }
 0x3ee   : > { %s1030_s27 = scalar_lea.sflag [#allocation7], %s1920_s7 }
 0x3f2   : > { %s2148_s17 = smov %s2147_s26  ;;  %s1046_s25 = scalar_lea.hbm %s2147_s26, %s1328_s11 }
 0x3f3   : > { %v1449_v58 = vld [vmem:[%s2149_s10] ss:$0 sm:$0xff]  ;;  %s1050_s0 = sshll.u32 %s1046_s25, 4  ;;  %s1634_s16 = scalar_lea.hbm %s2148_s17, 16  ;;  %s1051_s0 = int_to_ptr.hbm [resolvable:$true] %s1050_s0 }
 0x3f4   : > { %s1628_s15 = sshra.s32 %s1051_s0, 4  ;;  %s1629_s15 = int_to_ptr.hbm [resolvable:$true] %s1628_s15 }
 0x3f5   : > { %s1630_s19 = scalar_lea.hbm %s1629_s15, 8  ;;  %p1635_p3 = scmp.lt.s32.totalorder %s1629_s15, %s2148_s17 }
 0x3f6   : > { %p1631_p2 = scmp.ne.s32.totalorder %s1629_s15, %s1630_s19  ;;  %p1636_p6 = scmp.lt.s32.totalorder %s1634_s16, %s1630_s19 }
 0x3f8   : > { %p1632_p4 = pnand %p1631_p2, %p1836_p8  ;;  %p1637_p7 = por %p1636_p6, %p1635_p3 }
 0x3fa   : > { %p1633_p5 = pneg %p1632_p4 }
 0x3fc   : > { %p1638_p11 = pnand %p1637_p7, %p1633_p5 }
 0x464   : > { %v1024_v59 = vpop.f32.mrf.mxu1 }
 0x465   : > { %v1025_v60 = vadd.f32 %v1449_v58, %v1024_v59 }
 0x467   : > { %1028 = vst.msk [vmem:[%s545_s14] sm:$0xff] %vm691_vm0, %v1025_v60 }
 0x468   : > { %1641 = shalt.err (!%p1638_p11)
}
 0x469   : > { %1358 = dma.vmem_to_hbm [thread:$0]  (%p1836_p8), %s1049_s13, 128, %s1051_s0, %s1030_s27  }
 0x46c   : > { %v1026_v61 = vpop.f32.mrf.mxu1 }
 0x46d PF: > { %s2150_s7 = sld [smem:[#allocation21_spill]]  ;;  %p1377_p12 = pnand %p1241_p10, %p1843_p9 }
 0x46e   : > { %s2152_s24 = sld [smem:[#allocation24_spill]] }
 0x46f   : > { %p1378_p13 = pneg %p1377_p12 }
 0x473   : > { %s1080_s26 = sand.u32 1, %s2150_s7  }
 0x474   : > { %s1081_s25 = scalar_lea.sflag [#allocation7], %s1080_s26 }
 0x475   : > { %1679 = dma.done.wait (%p1378_p13), %s1081_s25, 128  }
 0x476   : > { %1681 = vsyncadd (%p1378_p13), %s1081_s25, 4294967168  ;;  %s1091_s28 = scalar_lea.sflag [#allocation15], %s1080_s26 }
 0x477   : > { %1683 = dma.done.wait (%p1378_p13), %s1091_s28, 256  }
 0x478   : > { %1685 = vsyncadd (%p1378_p13), %s1091_s28, 4294967040  ;;  %s36_s26 = sadd.s32 1, %s2152_s24   ;;  %s2153_s0 = sld [smem:[#allocation28_spill]] }
 0x479   : > { %p33_p0 = scmp.ge.s32.totalorder %s36_s26, 4   ;;  %s2154_s24 = sld [smem:[#allocation23_spill]] }
 0x47a   : > { %s2155_s25 = sld [smem:[#allocation25_spill]]  ;;  %s2156_s21 = smov %s1692_s22 }
 0x47b   : > { %s2157_s22 = smov %s1696_s23  ;;  %35 = sbr.rel (!%p33_p0) target bundleno = 19 (0x13), region = 161 }
 0x47e   : > { %s2158_s23 = smov %s2153_s0 }
 0x480   :  { %1097 = vsyncpa [#allocation6], 1 }
 0x481   :  { %1099 = vsyncpa [#allocation6 + $0x1], 1 }
 0x482   :  { %1100 = vsyncpa [#allocation9], 1 }
 0x483   :  { %1102 = vsyncpa [#allocation9 + $0x1], 1 }
 0x484   :  { %1103 = vsyncpa [#allocation12], 1 }
 0x485   :  { %1104 = vsyncpa [#allocation7], 1 }
 0x486   :  { %1106 = vsyncpa [#allocation7 + $0x1], 1 }
 0x487   :  { %1107 = vsyncpa [#allocation15], 1 }
 0x488   :  { %1109 = vsyncpa [#allocation15 + $0x1], 1 }

// kernel: tpu_custom_call.1
= control target key start
LH: loop header
LB: loop body
LE: loop exit
PB: predicated region body
PF: predicated region fallthrough
CT: control target
= control target key end

     0   :  { %s2092_s0 = inlined_call_operand.hbm [shape: bf16[2,8,32], index: 0, kind: input, shape index: {}]   ;;  %s2093_s1 = inlined_call_operand.hbm [shape: bf16[2,8,64], index: 1, kind: input, shape index: {}]   ;;  %s2094_s2 = inlined_call_operand.hbm [shape: bf16[2,8,64], index: 2, kind: input, shape index: {}]   ;;  %s2095_s3 = inlined_call_operand.vmem [shape: bf16[32,64], index: 3, kind: input, shape index: {}]   ;;  %s2096_s4 = inlined_call_operand.vmem [shape: f32[1,64], index: 4, kind: input, shape index: {}]   ;;  %s2097_s5 = inlined_call_operand.vmem [shape: bf16[64,64], index: 5, kind: input, shape index: {}]   ;;  %s2098_s6 = inlined_call_operand.vmem [shape: f32[1,64], index: 6, kind: input, shape index: {}]   ;;  %s2099_s7 = inlined_call_operand.hbm [shape: bf16[64,64], index: 7, kind: input, shape index: {}]   ;;  %s2100_s8 = inlined_call_operand.vmem [shape: f32[1,64], index: 8, kind: input, shape index: {}]   ;;  %s2101_s9 = inlined_call_operand.vmem [shape: bf16[64,32], index: 9, kind: input, shape index: {}]   ;;  %s2102_s10 = inlined_call_operand.vmem [shape: f32[1,32], index: 10, kind: input, shape index: {}]   ;;  %s2103_s11 = inlined_call_operand.hbm [shape: f32[2,8,32], index: 11, kind: output, shape index: {0}]   ;;  %s2104_s12 = inlined_call_operand.hbm [shape: bf16[2,4,8,8], index: 12, kind: output, shape index: {1}]  }
   0x1   :  { %2118 = sst [smem:[#allocation29_spill]] %s2092_s0 }
   0x2   :  { %2119 = sst [smem:[#allocation30_spill]] %s2093_s1 }
   0x3   :  { %2120 = sst [smem:[#allocation31_spill]] %s2099_s7 }
   0x4   :  { %2121 = sst [smem:[#allocation32_spill]] %s2101_s9 }
   0x5   :  { %2122 = sst [smem:[#allocation33_spill]] %s2102_s10 }
   0x6   :  { %2123 = sst [smem:[#allocation34_spill]] %s2103_s11 }
   0x7   :  { %2124 = sst [smem:[#allocation35_spill]] %s2104_s12 }
   0x8   :  { %18 = vsyncpa [#allocation6], 0 }
   0x9   :  { %20 = vsyncpa [#allocation6 + $0x1], 0 }
   0xa   :  { %21 = vsyncpa [#allocation9], 0 }
   0xb   :  { %23 = vsyncpa [#allocation9 + $0x1], 0 }
   0xc   :  { %24 = vsyncpa [#allocation12], 0 }
   0xd   :  { %25 = vsyncpa [#allocation7], 0 }
   0xe   :  { %27 = vsyncpa [#allocation7 + $0x1], 0 }
   0xf   :  { %28 = vsyncpa [#allocation15], 0 }
  0x10   :  { %30 = vsyncpa [#allocation15 + $0x1], 0  ;;  %s1786_s21 = smov 0   ;;  %s1788_s22 = smov 0  }
  0x11   :  { %s1790_s23 = smov 0   ;;  %s1792_s24 = smov 0  }
  0x12   :  { %s1794_s25 = smov 0   ;;  %s1796_s26 = smov 0  }
  0x13 LB: > { %2125 = sst [smem:[#allocation21_spill]] %s1688_s21  ;;  %s1817_s27 = sadd.s32 4294967295, %s1708_s26   ;;  %s1708_s26 = sphi %s1796_s26, %s36_s26   ;;  %s1704_s25 = sphi %s1794_s25, %s2155_s25   ;;  %s1700_s24 = sphi %s1792_s24, %s2154_s24   ;;  %s1696_s23 = sphi %s1790_s23, %s2158_s23   ;;  %s1692_s22 = sphi %s1788_s22, %s2157_s22   ;;  %s1688_s21 = sphi %s1786_s21, %s2156_s21  }
  0x14   : > { %2126 = sst [smem:[#allocation22_spill]] %s1700_s24  ;;  %s1238_s28 = sadd.s32 4294967294, %s1708_s26  }
  0x15   : > { %2127 = sst [smem:[#allocation23_spill]] %s1704_s25  ;;  %s48_s29 = sadd.s32 1, %s1704_s25 }
  0x16   : > { %2128 = sst [smem:[#allocation24_spill]] %s1708_s26  ;;  %s57_s30 = sadd.s32 1, %s1696_s23 }
  0x17   : > { %p50_p0 = scmp.ge.s32.totalorder %s48_s29, 2  ;;  %p64_p1 = scmp.ne.s32.totalorder %s1696_s23, %s1692_s22 }
  0x18   : > { %p65_p2 = scmp.eq.s32.totalorder %s1708_s26, 0  ;;  %p70_p3 = scmp.ne.s32.totalorder %s1692_s22, %s1688_s21 }
  0x19   : > { %s2160_s29 = smov (%p50_p0, %s48_s29), 0  ;;  %p316_p5 = scmp.eq.s32.totalorder %s1817_s27, 1 }
  0x1a   : > { %2129 = sst [smem:[#allocation25_spill]] %s2160_s29  ;;  %p1829_p4 = por %p65_p2, %p64_p1 }
  0x1b   : > { %s52_s14 = ssub.s32 %s1704_s25, %s2160_s29  ;;  %p322_p6 = scmp.eq.s32.totalorder %s1238_s28, 1 }
  0x1c   : > { %p55_p7 = scmp.eq.s32.totalorder %s52_s14, 0  ;;  %p1836_p8 = por %p316_p5, %p64_p1 }
  0x1d   : > { %p1843_p9 = por %p322_p6, %p70_p3  ;;  %p1241_p10 = scmp.ge.s32.totalorder %s1708_s26, 2 }
  0x1e   : > { %s2131_s15 = scalar_select %p1836_p8, 1, 0 }
  0x1f   : > { %s2133_s16 = scalar_select %p1843_p9, 1, 0 }
  0x20   : > { %2132 = sst [smem:[#allocation26_spill]] %s2131_s15  ;;  %p1384_p11 = scmp.lt.s32.totalorder %s1708_s26, 2 }
  0x21   : > { %2134 = sst [smem:[#allocation27_spill]] %s2133_s16  ;;  %s2108_s18 = sand.u32 1, %s1696_s23  }
  0x22   : > { %s1848_s17 = scalar_select %p55_p7, %s1696_s23, %s57_s30  }
  0x23   : > { %s1854_s19 = sshll.u32 %s1704_s25, 2  ;;  %s1858_s20 = sshll.u32 %s2108_s18, 2 }
  0x24   : > { %2135 = sst [smem:[#allocation28_spill]] %s1848_s17  ;;  %p1862_p12 = pnand %p1384_p11, %p1829_p4 }
  0x25   : > { %s425_s30 = sand.u32 1, %s1708_s26   ;;  %s2137_s1 = sld [smem:[#allocation30_spill]] }
  0x26   : > { %s429_s16 = scalar_lea.vmem [#allocation8], %s1858_s20  ;;  %s1872_s18 = scalar_lea.sflag [#allocation9], %s425_s30 }
  0x27   : > { %s437_s10 = sshll.u32 %s429_s16, 4  ;;  %p71_p13 = scmp.eq.s32.totalorder %s1817_s27, 0  ;;  %s438_s10 = int_to_ptr.vmem [resolvable:$true] %s437_s10 }
  0x28   : > { %p1239_p0 = scmp.ge.s32.totalorder %s1708_s26, 1  ;;  %p357_p1 = scmp.lt.s32.totalorder %s1708_s26, 3 }
  0x29   : > { %p1885_p2 = por %p71_p13, %p70_p3  ;;  %s2139_s7 = sld [smem:[#allocation31_spill]] }
  0x2a   : > { %p1892_p4 = pnand %p1239_p0, %p357_p1  ;;  %s2141_s0 = sld [smem:[#allocation29_spill]] }
  0x2b   : > { %s433_s17 = scalar_lea.hbm %s2137_s1, %s1854_s19  ;;  %s1712_s26 = smov 4  }
  0x2c   : > { %s435_s25 = sshll.u32 %s433_s17, 4  ;;  %p1362_p5 = pneg %p1892_p4  ;;  %s436_s25 = int_to_ptr.hbm [resolvable:$true] %s435_s25 }
  0x2d   : > { %1372 = dma.hbm_to_vmem [thread:$0]  (!%p1862_p12), %s436_s25, 64, %s438_s10, %s1872_s18  }
  0x2e   : > { %s1710_s10 = smov [#allocation11]   ;;  %p1363_p3 = pnand %p1362_p5, %p71_p13 }
  0x2f   : > { %s380_s17 = sshll.u32 %s2139_s7, 4  ;;  %s382_s25 = sshll.u32 %s1710_s10, 4  ;;  %s381_s17 = int_to_ptr.hbm [resolvable:$true] %s380_s17  ;;  %s383_s25 = int_to_ptr.vmem [resolvable:$true] %s382_s25 }
  0x30   : > { %s414_s16 = scalar_lea.hbm %s2141_s0, %s1854_s19  ;;  %s1711_s7 = smov 64  }
  0x31   : > { %s416_s1 = sshll.u32 %s414_s16, 4  ;;  %s409_s21 = scalar_lea.vmem [#allocation5], %s1858_s20  ;;  %s417_s1 = int_to_ptr.hbm [resolvable:$true] %s416_s1 }
  0x32   : > { %1365 = dma.hbm_to_vmem [thread:$0]  (!%p1363_p3), %s381_s17, 512, %s383_s25, [#allocation12], %s1711_s7, %s1711_s7, %s1712_s26  }
  0x33   : > { %s418_s11 = sshll.u32 %s409_s21, 4  ;;  %s2142_s12 = sand.u32 1, %s1696_s23   ;;  %s419_s11 = int_to_ptr.vmem [resolvable:$true] %s418_s11 }
  0x34   : > { %s406_s15 = scalar_lea.sflag [#allocation6], %s2142_s12  ;;  %s452_s9 = scalar_lea.hbm %s2094_s2, %s1854_s19 }
  0x35   : > { %1369 = dma.hbm_to_vmem [thread:$0]  (!%p1862_p12), %s417_s1, 64, %s419_s11, %s406_s15  }
  0x36   : > { %s448_s14 = scalar_lea.vmem [#allocation10], %s1858_s20  ;;  %s454_s16 = sshll.u32 %s452_s9, 4  ;;  %s455_s16 = int_to_ptr.hbm [resolvable:$true] %s454_s16 }
  0x37   : > { %s456_s13 = sshll.u32 %s448_s14, 4  ;;  %465 = sbr.rel (%p1892_p4) target bundleno = 1133 (0x46d), region = 64  ;;  %s457_s13 = int_to_ptr.vmem [resolvable:$true] %s456_s13 }
  0x38   : > { %1375 = dma.hbm_to_vmem [thread:$0]  (!%p1862_p12), %s455_s16, 64, %s457_s13, %s1872_s18  }
  0x39   : > { %s1920_s7 = sand.u32 (!%p1892_p4), 1, %s1692_s22  }
  0x3a   : > { %s1923_s1 = sshll.u32 (!%p1892_p4), %s1920_s7, 2  ;;  %s468_s11 = scalar_lea.sflag (!%p1892_p4), [#allocation6], %s1920_s7 }
  0x3b   : > { %s471_s12 = scalar_lea.vmem (!%p1892_p4), [#allocation5], %s1923_s1 }
  0x3c   : > { %1667 = dma.done.wait (%p1885_p2), %s468_s11, 64  }
  0x3d   : > { %1669 = vsyncadd (%p1885_p2), %s468_s11, 4294967232  ;;  %s477_s9 = sand.u32 1, %s1817_s27   ;;  %s481_s24 = scalar_lea.vmem [#allocation8], %s1923_s1 }
  0x3e   : > { %s478_s21 = scalar_lea.sflag [#allocation9], %s477_s9 }
  0x3f   : > { %1671 = dma.done.wait (%p1885_p2), %s478_s21, 128  }
  0x40   : > { %1673 = vsyncadd (%p1885_p2), %s478_s21, 4294967168  ;;  %s491_s26 = scalar_lea.vmem [#allocation10], %s1923_s1 }
  0x41   : > { %1675 = dma.done.wait (%p71_p13), [#allocation12], 512  }
  0x42   : > { %1677 = vsyncadd (%p71_p13), [#allocation12], 4294966784  ;;  %v1336_v0 = vld [vmem:[%s2097_s5 + $0x18] sm:$0xff]  ;;  %v1342_v1 = vld [vmem:[%s2095_s3 + $0x8] sm:$0xff]  ;;  %vm691_vm0 = vcmask 261120   ;;  %vm595_vm1 = vcmask 523264  }
  0x43   : > { %603 = vmatpush.bf16.msra.mxu0 %v1336_v0  ;;  %v1335_v2 = vld [vmem:[%s2097_s5 + $0x10] sm:$0xff]  ;;  %701 = vmatpush.bf16.msra.mxu2 %v1342_v1  ;;  %v1341_v3 = vld [vmem:[%s2095_s3] sm:$0xff]  ;;  %v1334_v4 = vld [vmem:[%s2097_s5 + $0x8] sm:$0xff]  ;;  %vm666_vm2 = vcmask 519168   ;;  %vm712_vm3 = vcmask 130048   ;;  %s1713_s9 = smov 96  }
  0x44   : > { %v670_v5 = vld [vmem:[%s471_s12] sm:$0xf]  ;;  %v1333_v6 = vld [vmem:[%s2097_s5] sm:$0xff]  ;;  %v558_v7 = vld [vmem:[%s481_s24] sm:$0xf]  ;;  %s1714_s21 = smov 112  }
  0x45   : > { %v1340_v8 = vld [vmem:[#allocation11 + $0x18] sm:$0xff]  ;;  %v1339_v9 = vld [vmem:[#allocation11 + $0x10] sm:$0xff]  ;;  %v1338_v13 = vld [vmem:[#allocation11 + $0x8] sm:$0xff]  ;;  %s1715_s24 = smov 80   ;;  %vm732_vm4 = vcmask 64512   ;;  %vm750_vm5 = vcmask 1043456  }
  0x46   : > { %656 = vmatpush.bf16.msra.mxu1 %v1340_v8  ;;  %v1447_v10 = vld [vmem:[%s2096_s4] ss:$0 sm:$0xff]  ;;  %v1337_v28 = vld [vmem:[#allocation11] sm:$0xff]  ;;  %s1254_s15 = sshll.u32 %s1920_s7, 4  ;;  %vm745_vm6 = vcmask 60416   ;;  %vm768_vm7 = vcmask 125952  }
  0x47   : > { %604 = vmatpush.bf16.msra.mxu0 %v1335_v2  ;;  %702 = vmatpush.bf16.msra.mxu2 %v1341_v3  ;;  %v1446_v11 = vld [vmem:[%s2098_s6] ss:$0 sm:$0xff]  ;;  %s2000_s18 = scalar_lea.vmem [#allocation14], %s1254_s15  ;;  %s1716_s19 = smov 16   ;;  %vm842_vm8 = vcmask 257152   ;;  %vm907_vm9 = vcmask 388352  }
  0x48   : > { %v612_v29 = vld [vmem:[%s491_s26] sm:$0xf]  ;;  %s1717_s20 = smov 32   ;;  %s1718_s28 = smov 48   ;;  %vm972_vm10 = vcmask 519552  }
  0x49   : > { %v1448_v42 = vld [vmem:[%s2100_s8] ss:$0 sm:$0xff]  ;;  %s2143_s30 = sld [smem:[#allocation32_spill]]  ;;  %s1063_s15 = sshll.u32 %s2000_s18, 4  ;;  %s1064_s15 = int_to_ptr.vmem [resolvable:$true] %s1063_s15 }
  0x4a   : > { %1297 = vmatmul.msk.bf16.vlgmr.msra.gmra.mxu2 %vm691_vm0, %v670_v5  ;;  %657 = vmatpush.bf16.msra.mxu1 %v1339_v9  ;;  %s2144_s27 = sld [smem:[#allocation22_spill]] }
  0x4b   : > { %605 = vmatpush.bf16.msra.mxu0 %v1334_v4  ;;  %s2146_s1 = sld [smem:[#allocation35_spill]] }
  0x4e   : > { %658 = vmatpush.bf16.msra.mxu1 %v1338_v13 }
  0x4f   : > { %606 = vmatpush.bf16.msra.mxu0 %v1333_v6 }
  0x51   : > { %s1606_s10 = scalar_lea.hbm %s2146_s1, 32 }
  0x52   : > { %1271 = vmatmul.msk.bf16.vlgmr.msra.gmra.mxu0 %vm595_vm1, %v558_v7  ;;  %659 = vmatpush.bf16.msra.mxu1 %v1337_v28 }
  0x55   : > { %1288 = vmatmul.msk.bf16.vlgmr.msra.gmra.mxu1 %vm595_vm1, %v612_v29 }
  0xcd   : > { %v704_v12 = vpop.f32.mrf.mxu2 }
  0xce   : > { %v705_v15 = vadd.f32 %v1447_v10, %v704_v12 }
  0xcf   : > { %v608_v14 = vpop.f32.mrf.mxu0 }
  0xd0   : > { %v609_v16 = vadd.f32 %v1446_v11, %v608_v14  ;;  %v708_v17 = vmul.f32 0.25, %v705_v15 }
  0xd2   : > { %v665_v18 = vpack.c.bf16 %v609_v16, %v609_v16  ;;  %v709_v19 = vpack.c.bf16 %v708_v17, %v708_v17  ;;  %v661_v43 = vpop.f32.mrf.mxu1 }
  0xd3   : > { %v662_v44 = vadd.f32 %v1448_v42, %v661_v43 }
  0xd4   : > { %667 = vst.msk [vmem:[#allocation2] sm:$0xf] %vm666_vm2, %v665_v18  ;;  %v771_v20 = vunpack.c.l.b16 %v709_v19 }
  0xd5   : > { %v706_v21 = vpop.f32.mrf.mxu2  ;;  %v668_v45 = vpack.c.bf16 %v662_v44, %v662_v44 }
  0xd6   : > { %v772_v23 = vpack.c.b16 %v771_v20, %v771_v20 }
  0xd7   : > { %v610_v22 = vpop.f32.mrf.mxu0  ;;  %669 = vst.msk [vmem:[#allocation3] sm:$0xf] %vm666_vm2, %v668_v45 }
  0xd8   : > { %844 = vrot.lane.b32.xlu2 %v772_v23, %s1713_s9 }
  0xda   : > { %v663_v46 = vpop.f32.mrf.mxu1 }
  0xdb   : > { %v710_v24 = vld [vmem:[#allocation2] sm:$0xf] }
  0xdc   : > { %v717_v25 = vsel %vm712_vm3, %v710_v24, 0  ;;  %v776_v26 = vunpack.c.l.b16 %v710_v24 }
  0xdd   : > { %726 = vmatpush.bf16.xpose.msra.mxu3 %v717_v25 }
  0xde   : > { %v777_v27 = vpack.c.b16 %v776_v26, %v776_v26  ;;  %v711_v47 = vld [vmem:[#allocation3] sm:$0xf] }
  0xdf   : > { %v752_v48 = vsel %vm750_vm5, %v711_v47, 0  ;;  %v814_v63 = vunpack.c.l.b16 %v711_v47 }
  0xe0   : > { %846 = vrot.lane.b32.xlu1 %v777_v27, %s1713_s9  ;;  %778 = vrot.lane.b32.xlu0 %v777_v27, %s1714_s21 }
  0xe1   : > { %909 = vrot.lane.b32.xlu2 %v772_v23, %s1715_s24  ;;  %761 = vmatpush.bf16.msrb.mxu2 %v752_v48  ;;  %v815_v0 = vpack.c.b16 %v814_v63, %v814_v63 }
  0xe4   : > { %1298 = vmatmul.msk.bf16.vlgmr.msra.gmra.mxu3 %vm712_vm3, %v709_v19 }
  0xe8   : > { %911 = vrot.lane.b32.xlu1 %v777_v27, %s1715_s24  ;;  %773 = vrot.lane.b32.xlu0 %v772_v23, %s1714_s21 }
 0x132   : > { %v845_v34 = vpop.permute.xlu2 %844 }
 0x13b   : > { %v910_v40 = vpop.permute.xlu2 %909 }
 0x152   : > { %v847_v30 = vpop.permute.xlu1 %846  ;;  %v779_v31 = vpop.permute.xlu0 %778 }
 0x153   : > { %v784_v32 = vsel %vm712_vm3, %v779_v31, 0  ;;  %v852_v33 = vsel %vm712_vm3, %v847_v30, 0 }
 0x154   : > { %793 = vmatpush.bf16.xpose.msrb.mxu3 %v784_v32  ;;  %861 = vmatpush.bf16.xpose.msrb.mxu1 %v852_v33 }
 0x15a   : > { %v912_v35 = vpop.permute.xlu1 %911  ;;  %v774_v36 = vpop.permute.xlu0 %773 }
 0x15b   : > { %v917_v37 = vsel %vm712_vm3, %v912_v35, 0  ;;  %1300 = vmatmul.msk.bf16.vlgmr.msrb.gmra.mxu3 %vm712_vm3, %v774_v36  ;;  %1303 = vmatmul.msk.bf16.vlgmr.msrb.gmra.mxu1 %vm712_vm3, %v845_v34 }
 0x15c   : > { %926 = vmatpush.bf16.xpose.msra.mxu3 %v917_v37 }
 0x167   : > { %v728_v38 = vpop.f32.mrf.mxu3 }
 0x168   : > { %v733_v39 = vsel %vm732_vm4, %v728_v38, -inf }
 0x169   : > { %734 = vmax.xlane.f32.xlu0 %v733_v39 }
 0x16b   : > { %1306 = vmatmul.msk.bf16.vlgmr.msra.gmra.mxu3 %vm712_vm3, %v910_v40 }
 0x16f   : > { %v730_v41 = vpop.f32.mrf.mxu3 }
 0x1d8   : > { %v863_v49 = vpop.f32.mrf.mxu1 }
 0x1d9   : > { %v867_v50 = vsel %vm732_vm4, %v863_v49, -inf }
 0x1da   : > { %868 = vmax.xlane.f32.xlu2 %v867_v50  ;;  %v1346_v50 = vld [vmem:[%s2143_s30 + $0x18] sm:$0xff] }
 0x1db   : > { %1019 = vmatpush.bf16.msra.mxu1 %v1346_v50 }
 0x1dc   : > { %v735_v51 = vpop.xlane.xlu0 %734 }
 0x1dd   : > { %v736_v52 = vsub.f32 %v728_v38, %v735_v51 }
 0x1de   : > { %v795_v53 = vpop.f32.mrf.mxu3 }
 0x1df   : > { %v737_v54 = vmul.f32 1.442695, %v736_v52  ;;  %v799_v55 = vsel %vm732_vm4, %v795_v53, -inf  ;;  %v1345_v52 = vld [vmem:[%s2143_s30 + $0x10] sm:$0xff] }
 0x1e0   : > { %v865_v56 = vpop.f32.mrf.mxu1  ;;  %800 = vmax.xlane.f32.xlu1 %v799_v55  ;;  %1020 = vmatpush.bf16.msra.mxu1 %v1345_v52 }
 0x1e1   : > { %1450 = vpow2.f32 %v737_v54  ;;  %v1343_v54 = vld [vmem:[%s2143_s30] sm:$0xff] }
 0x1e6   : > { %v797_v57 = vpop.f32.mrf.mxu3 }
 0x1e7   : > { %v1451_v58 = vpop.eup %1450 }
 0x1e8   : > { %v739_v59 = vsel %vm732_vm4, %v1451_v58, 0.0 }
 0x1e9   : > { %740 = vadd.xlane.f32.xlu0 %v739_v59 }
 0x1ee   : > { %v928_v60 = vpop.f32.mrf.mxu3 }
 0x1ef   : > { %v932_v61 = vsel %vm732_vm4, %v928_v60, -inf }
 0x1f0   : > { %933 = vmax.xlane.f32.xlu2 %v932_v61 }
 0x1f6   : > { %v930_v62 = vpop.f32.mrf.mxu3 }
 0x208   : > { %816 = vrot.lane.b32.xlu2 %v815_v0, %s1714_s21 }
 0x24d   : > { %v869_v1 = vpop.xlane.xlu2 %868 }
 0x24e   : > { %v870_v2 = vsub.f32 %v863_v49, %v869_v1 }
 0x250   : > { %v871_v3 = vmul.f32 1.442695, %v870_v2 }
 0x252   : > { %1452 = vpow2.f32 %v871_v3 }
 0x253   : > { %v801_v4 = vpop.xlane.xlu1 %800 }
 0x254   : > { %v802_v5 = vsub.f32 %v795_v53, %v801_v4  ;;  %v1344_v53 = vld [vmem:[%s2143_s30 + $0x8] sm:$0xff] }
 0x255   : > { %1021 = vmatpush.bf16.msra.mxu1 %v1344_v53 }
 0x256   : > { %v803_v6 = vmul.f32 1.442695, %v802_v5 }
 0x258   : > { %v1453_v7 = vpop.eup %1452  ;;  %1454 = vpow2.f32 %v803_v6 }
 0x259   : > { %v873_v8 = vsel %vm732_vm4, %v1453_v7, 0.0  ;;  %1022 = vmatpush.bf16.msra.mxu1 %v1343_v54 }
 0x25a   : > { %874 = vadd.xlane.f32.xlu0 %v873_v8 }
 0x25c   : > { %v741_v9 = vpop.xlane.xlu0 %740 }
 0x25d   : > { %1456 = vrcp.f32 %v741_v9 }
 0x25e   : > { %v1455_v10 = vpop.eup %1454 }
 0x25f   : > { %v805_v11 = vsel %vm732_vm4, %v1455_v10, 0.0 }
 0x260   : > { %806 = vadd.xlane.f32.xlu1 %v805_v11 }
 0x263   : > { %v1457_v12 = vpop.eup %1456  ;;  %v934_v13 = vpop.xlane.xlu2 %933 }
 0x264   : > { %v743_v14 = vmul.f32 %v1457_v12, %v1451_v58  ;;  %v935_v15 = vsub.f32 %v928_v60, %v934_v13 }
 0x266   : > { %v936_v16 = vmul.f32 1.442695, %v935_v15  ;;  %v744_v17 = vpack.c.bf16 %v743_v14, %v743_v14 }
 0x268   : > { %1458 = vpow2.f32 %v936_v16  ;;  %746 = vst.msk [vmem:[%s2000_s18] sm:$0xf] %vm745_vm6, %v744_v17  ;;  %1299 = vmatmul.msk.bf16.vlgmr.msrb.gmra.mxu2 %vm732_vm4, %v744_v17 }
 0x26b   : > { %v817_v18 = vpop.permute.xlu2 %816 }
 0x26c   : > { %v822_v19 = vsel %vm750_vm5, %v817_v18, 0 }
 0x26d   : > { %831 = vmatpush.bf16.msrb.mxu0 %v822_v19 }
 0x26e   : > { %v1459_v20 = vpop.eup %1458  ;;  %881 = vrot.lane.b32.xlu0 %v815_v0, %s1713_s9  ;;  %s1347_s9 = sshll.u32 %s2144_s27, 4 }
 0x26f   : > { %v938_v21 = vsel %vm732_vm4, %v1459_v20, 0.0  ;;  %s1062_s26 = scalar_lea.hbm %s2146_s1, %s1347_s9 }
 0x270   : > { %939 = vadd.xlane.f32.xlu1 %v938_v21 }
 0x289   : > { %946 = vrot.lane.b32.xlu1 %v815_v0, %s1715_s24 }
 0x2cd   : > { %v875_v22 = vpop.xlane.xlu0 %874 }
 0x2ce   : > { %1460 = vrcp.f32 %v875_v22 }
 0x2d3   : > { %v807_v23 = vpop.xlane.xlu1 %806 }
 0x2d4   : > { %v1461_v24 = vpop.eup %1460  ;;  %1462 = vrcp.f32 %v807_v23 }
 0x2d5   : > { %v877_v25 = vmul.f32 %v1461_v24, %v1453_v7 }
 0x2d7   : > { %v878_v26 = vpack.c.bf16 %v877_v25, %v877_v25 }
 0x2d9   : > { %1304 = vst.msk [vmem:[%s2000_s18 + $0x8] sm:$0xf] %vm745_vm6, %v878_v26 }
 0x2da   : > { %v1463_v27 = vpop.eup %1462 }
 0x2db   : > { %v809_v28 = vmul.f32 %v1463_v27, %v1455_v10 }
 0x2dd   : > { %v810_v29 = vpack.c.bf16 %v809_v28, %v809_v28 }
 0x2df   : > { %1301 = vst.msk [vmem:[%s2000_s18 + $0x4] sm:$0xf] %vm745_vm6, %v810_v29  ;;  %1302 = vmatmul.msk.bf16.vlgmr.msrb.gmra.mxu0 %vm732_vm4, %v810_v29 }
 0x2e0   : > { %v882_v30 = vpop.permute.xlu0 %881 }
 0x2e1   : > { %v887_v31 = vsel %vm750_vm5, %v882_v30, 0 }
 0x2e2   : > { %896 = vmatpush.bf16.msra.mxu2 %v887_v31 }
 0x2e3   : > { %v940_v32 = vpop.xlane.xlu1 %939 }
 0x2e4   : > { %1464 = vrcp.f32 %v940_v32 }
 0x2e5   : > { %1305 = vmatmul.msk.bf16.vlgmr.msra.gmra.mxu2 %vm732_vm4, %v878_v26 }
 0x2ea   : > { %v1465_v33 = vpop.eup %1464 }
 0x2eb   : > { %v942_v34 = vmul.f32 %v1465_v33, %v1459_v20  ;;  %v763_v35 = vpop.f32.mrf.mxu2 }
 0x2ec   : > { %v767_v36 = vpack.c.bf16 %v763_v35, %v763_v35 }
 0x2ed   : > { %v943_v37 = vpack.c.bf16 %v942_v34, %v942_v34 }
 0x2ee   : > { %769 = vst.msk [vmem:[#allocation4] sm:$0xf] %vm768_vm7, %v767_v36 }
 0x2ef   : > { %1307 = vst.msk [vmem:[%s2000_s18 + $0xc] sm:$0xf] %vm745_vm6, %v943_v37 }
 0x2f3   : > { %v765_v38 = vpop.f32.mrf.mxu2 }
 0x2fb   : > { %v947_v39 = vpop.permute.xlu1 %946 }
 0x2fc   : > { %v952_v40 = vsel %vm750_vm5, %v947_v39, 0 }
 0x2fd   : > { %961 = vmatpush.bf16.msra.mxu0 %v952_v40 }
 0x300   : > { %1308 = vmatmul.msk.bf16.vlgmr.msra.gmra.mxu0 %vm732_vm4, %v943_v37 }
 0x35c   : > { %v833_v41 = vpop.f32.mrf.mxu0 }
 0x35d   : > { %v837_v42 = vpack.c.bf16 %v833_v41, %v833_v41 }
 0x35f   : > { %839 = vrot.lane.b32.xlu2 %v837_v42, %s1716_s19  ;;  %s1065_s19 = sshll.u32 %s1062_s26, 4  ;;  %s1066_s19 = int_to_ptr.hbm [resolvable:$true] %s1065_s19 }
 0x364   : > { %v835_v43 = vpop.f32.mrf.mxu0 }
 0x368   : > { %v898_v44 = vpop.f32.mrf.mxu2 }
 0x369   : > { %v902_v45 = vpack.c.bf16 %v898_v44, %v898_v44 }
 0x36b   : > { %904 = vrot.lane.b32.xlu0 %v902_v45, %s1717_s20  ;;  %s1035_s20 = scalar_lea.sflag [#allocation15], %s1920_s7 }
 0x370   : > { %v900_v46 = vpop.f32.mrf.mxu2 }
 0x37d   : > { %v963_v47 = vpop.f32.mrf.mxu0 }
 0x37e   : > { %v967_v48 = vpack.c.bf16 %v963_v47, %v963_v47 }
 0x380   : > { %969 = vrot.lane.b32.xlu2 %v967_v48, %s1718_s28  ;;  %s1600_s28 = sshra.s32 %s1066_s19, 4  ;;  %s1601_s28 = int_to_ptr.hbm [resolvable:$true] %s1600_s28 }
 0x381   : > { %s1602_s29 = scalar_lea.hbm %s1601_s28, 16  ;;  %p1607_p12 = scmp.lt.s32.totalorder %s1601_s28, %s2146_s1 }
 0x382   : > { %p1603_p6 = scmp.ne.s32.totalorder %s1601_s28, %s1602_s29  ;;  %p1608_p13 = scmp.lt.s32.totalorder %s1606_s10, %s1602_s29 }
 0x384   : > { %p1604_p7 = pnand %p1603_p6, %p1836_p8  ;;  %p1609_p0 = por %p1608_p13, %p1607_p12 }
 0x385   : > { %v965_v49 = vpop.f32.mrf.mxu0 }
 0x386   : > { %p1605_p11 = pneg %p1604_p7 }
 0x388   : > { %p1610_p1 = pnand %p1609_p0, %p1605_p11 }
 0x3b9   : > { %v840_v51 = vpop.permute.xlu2 %839 }
 0x3ba   : > { %843 = vst.msk [vmem:[#allocation4] sm:$0xf] %vm842_vm8, %v840_v51 }
 0x3da   : > { %v970_v56 = vpop.permute.xlu2 %969 }
 0x3dd   : > { %v905_v55 = vpop.permute.xlu0 %904 }
 0x3de   : > { %908 = vst.msk [vmem:[#allocation4] sm:$0xf] %vm907_vm9, %v905_v55 }
 0x3df   : > { %973 = vst.msk [vmem:[#allocation4] sm:$0xf] %vm972_vm10, %v970_v56 }
 0x3e6   : > { %v974_v57 = vld [vmem:[#allocation4] sm:$0xf] }
 0x3e7   : > { %1325 = vmatmul.msk.bf16.vlgmr.msra.gmra.mxu1 %vm595_vm1, %v974_v57 }
 0x3e8   : > { %1613 = shalt.err (!%p1610_p1)
}
 0x3e9   : > { %s1719_s18 = smov 64   ;;  %s1720_s16 = smov 4  }
 0x3ea   : > { %1359 = dma.vmem_to_hbm [thread:$0]  (%p1836_p8), %s1064_s15, 256, %s1066_s19, %s1035_s20, %s1719_s18, %s1719_s18, %s1720_s16  }
 0x3eb   : > { %s1328_s11 = sshll.u32 %s2144_s27, 3  ;;  %s1253_s9 = sshll.u32 %s1920_s7, 3 }
 0x3ec   : > { %s2147_s26 = sld [smem:[#allocation34_spill]]  ;;  %s545_s14 = scalar_lea.vmem [#allocation13], %s1253_s9 }
 0x3ed   : > { %s2149_s10 = sld [smem:[#allocation33_spill]]  ;;  %s1048_s13 = sshll.u32 %s545_s14, 4  ;;  %s1049_s13 = int_to_ptr.vmem [resolvable:$true] %s1048_s13 }
 0x3ee   : > { %s1030_s27 = scalar_lea.sflag [#allocation7], %s1920_s7 }
 0x3f2   : > { %s2148_s17 = smov %s2147_s26  ;;  %s1046_s25 = scalar_lea.hbm %s2147_s26, %s1328_s11 }
 0x3f3   : > { %v1449_v58 = vld [vmem:[%s2149_s10] ss:$0 sm:$0xff]  ;;  %s1050_s0 = sshll.u32 %s1046_s25, 4  ;;  %s1634_s16 = scalar_lea.hbm %s2148_s17, 16  ;;  %s1051_s0 = int_to_ptr.hbm [resolvable:$true] %s1050_s0 }
 0x3f4   : > { %s1628_s15 = sshra.s32 %s1051_s0, 4  ;;  %s1629_s15 = int_to_ptr.hbm [resolvable:$true] %s1628_s15 }
 0x3f5   : > { %s1630_s19 = scalar_lea.hbm %s1629_s15, 8  ;;  %p1635_p3 = scmp.lt.s32.totalorder %s1629_s15, %s2148_s17 }
 0x3f6   : > { %p1631_p2 = scmp.ne.s32.totalorder %s1629_s15, %s1630_s19  ;;  %p1636_p6 = scmp.lt.s32.totalorder %s1634_s16, %s1630_s19 }
 0x3f8   : > { %p1632_p4 = pnand %p1631_p2, %p1836_p8  ;;  %p1637_p7 = por %p1636_p6, %p1635_p3 }
 0x3fa   : > { %p1633_p5 = pneg %p1632_p4 }
 0x3fc   : > { %p1638_p11 = pnand %p1637_p7, %p1633_p5 }
 0x464   : > { %v1024_v59 = vpop.f32.mrf.mxu1 }
 0x465   : > { %v1025_v60 = vadd.f32 %v1449_v58, %v1024_v59 }
 0x467   : > { %1028 = vst.msk [vmem:[%s545_s14] sm:$0xff] %vm691_vm0, %v1025_v60 }
 0x468   : > { %1641 = shalt.err (!%p1638_p11)
}
 0x469   : > { %1358 = dma.vmem_to_hbm [thread:$0]  (%p1836_p8), %s1049_s13, 128, %s1051_s0, %s1030_s27  }
 0x46c   : > { %v1026_v61 = vpop.f32.mrf.mxu1 }
 0x46d PF: > { %s2150_s7 = sld [smem:[#allocation21_spill]]  ;;  %p1377_p12 = pnand %p1241_p10, %p1843_p9 }
 0x46e   : > { %s2152_s24 = sld [smem:[#allocation24_spill]] }
 0x46f   : > { %p1378_p13 = pneg %p1377_p12 }
 0x473   : > { %s1080_s26 = sand.u32 1, %s2150_s7  }
 0x474   : > { %s1081_s25 = scalar_lea.sflag [#allocation7], %s1080_s26 }
 0x475   : > { %1679 = dma.done.wait (%p1378_p13), %s1081_s25, 128  }
 0x476   : > { %1681 = vsyncadd (%p1378_p13), %s1081_s25, 4294967168  ;;  %s1091_s28 = scalar_lea.sflag [#allocation15], %s1080_s26 }
 0x477   : > { %1683 = dma.done.wait (%p1378_p13), %s1091_s28, 256  }
 0x478   : > { %1685 = vsyncadd (%p1378_p13), %s1091_s28, 4294967040  ;;  %s36_s26 = sadd.s32 1, %s2152_s24   ;;  %s2153_s0 = sld [smem:[#allocation28_spill]] }
 0x479   : > { %p33_p0 = scmp.ge.s32.totalorder %s36_s26, 4   ;;  %s2154_s24 = sld [smem:[#allocation23_spill]] }
 0x47a   : > { %s2155_s25 = sld [smem:[#allocation25_spill]]  ;;  %s2156_s21 = smov %s1692_s22 }
 0x47b   : > { %s2157_s22 = smov %s1696_s23  ;;  %35 = sbr.rel (!%p33_p0) target bundleno = 19 (0x13), region = 161 }
 0x47e   : > { %s2158_s23 = smov %s2153_s0 }
 0x480   :  { %1097 = vsyncpa [#allocation6], 1 }
 0x481   :  { %1099 = vsyncpa [#allocation6 + $0x1], 1 }
 0x482   :  { %1100 = vsyncpa [#allocation9], 1 }
 0x483   :  { %1102 = vsyncpa [#allocation9 + $0x1], 1 }
 0x484   :  { %1103 = vsyncpa [#allocation12], 1 }
 0x485   :  { %1104 = vsyncpa [#allocation7], 1 }
 0x486   :  { %1106 = vsyncpa [#allocation7 + $0x1], 1 }
 0x487   :  { %1107 = vsyncpa [#allocation15], 1 }
 0x488   :  { %1109 = vsyncpa [#allocation15 + $0x1], 1 }

</bundles_post_ra>
